<compile_context>
chip_gen: v7x
topology: tpu7x:2x2x1
jax: 0.10.0
libtpu: 0.0.40
codegen_flags: <defaults>
</compile_context>

<pallas_src>
import functools

import jax
import jax.numpy as jnp
from jax.experimental import pallas as pl
from jax.experimental.pallas import tpu as pltpu


def _round_up(a, b):
    return (a + b - 1) // b * b


# ----------------------------------------------------------------------------
# Kernel (transposed layout: activations are (H_pad, tile_m))
# ----------------------------------------------------------------------------
def _pinn_mlp_kernel(n_res_blocks, d_in, d_out, x_ref, *refs):
    """refs = (W0t, b0, [W1t, b1, W2t, b2] * n_res_blocks, Wout, bout, o_ref)

    W*t are pre-transposed/padded to (H_pad, ...) in the wrapper; biases are
    (H_pad, 1) f32 columns; Wout is (H_pad, d_out); bout is (d_out, 1).
    """
    o_ref = refs[-1]
    params = refs[:-1]

    xt = x_ref[...].astype(jnp.float32)          # (d_in, tile_m)

    w0 = params[0][...]                          # (H_pad, d_in), compute dtype
    b0 = params[1][...]                          # (H_pad, 1), f32

    if d_in == 1:
        # Contraction depth 1 -> outer product on the VPU, no MXU round-trip.
        pre = w0.astype(jnp.float32) * xt        # (H_pad, tile_m)
    else:
        pre = jnp.dot(w0.astype(jnp.float32), xt,
                      preferred_element_type=jnp.float32)
    h = jnp.tanh(pre + b0)                       # f32 (H_pad, tile_m)

    # Residual blocks: h = tanh( W2t @ tanh(W1t @ h + b1) + b2 + h )
    idx = 2
    for _ in range(n_res_blocks):
        w1 = params[idx][...]
        b1 = params[idx + 1][...]
        w2 = params[idx + 2][...]
        b2 = params[idx + 3][...]
        idx += 4
        t = jnp.tanh(jnp.dot(w1, h.astype(w1.dtype),
                             preferred_element_type=jnp.float32) + b1)
        t = jnp.dot(w2, t.astype(w2.dtype),
                    preferred_element_type=jnp.float32) + b2
        h = jnp.tanh(t + h)

    # Output projection: lane-dense (d_out, tile_m) result.
    w_out = params[idx][...]                     # (H_pad, d_out)
    b_out = params[idx + 1][...]                 # (d_out, 1), f32
    if d_out == 1:
        # VPU multiply + sublane (XLU) reduce instead of an N=1 MXU dot.
        out = jnp.sum(h * w_out.astype(jnp.float32), axis=0, keepdims=True) + b_out
    else:
        out = jax.lax.dot_general(
            w_out.astype(jnp.float32), h,
            dimension_numbers=(((0,), (0,)), ((), ())),
            preferred_element_type=jnp.float32) + b_out

    o_ref[...] = out.astype(o_ref.dtype)


# ----------------------------------------------------------------------------
# Parameter preparation: transpose, pad hidden to H_pad, cast matmul operands.
# ----------------------------------------------------------------------------
def _prepare_params(params, hidden_pad, compute_dtype):
    n_res = (len(params) - 4) // 4
    d_in = params[0].shape[0]
    d_out = params[-2].shape[1]

    def pad_to(a, shape):
        return jnp.pad(a, [(0, s - d) for s, d in zip(shape, a.shape)])

    out = []
    w0, b0 = params[0], params[1]
    out.append(pad_to(w0.T, (hidden_pad, d_in)).astype(compute_dtype))
    out.append(pad_to(b0.T, (hidden_pad, 1)).astype(jnp.float32))
    idx = 2
    for _ in range(n_res):
        w1, b1, w2, b2 = params[idx:idx + 4]
        idx += 4
        out.append(pad_to(w1.T, (hidden_pad, hidden_pad)).astype(compute_dtype))
        out.append(pad_to(b1.T, (hidden_pad, 1)).astype(jnp.float32))
        out.append(pad_to(w2.T, (hidden_pad, hidden_pad)).astype(compute_dtype))
        out.append(pad_to(b2.T, (hidden_pad, 1)).astype(jnp.float32))
    w_out, b_out = params[idx], params[idx + 1]
    out.append(pad_to(w_out, (hidden_pad, d_out)).astype(compute_dtype))  # kept (H, d_out)
    out.append(b_out.T.astype(jnp.float32))                               # (d_out, 1)
    return out, n_res, d_in, d_out


# ----------------------------------------------------------------------------
# Wrapper
# ----------------------------------------------------------------------------
def pinn_forward(x, params, *, tile_m=None, compute_dtype=jnp.float32):
    """GrossPitaevskiiPINN forward pass via a single Pallas TPU kernel.

    x       : (N, d_in) float32
    params  : flat list [W0, b0, (W1, b1, W2, b2)*n_res, Wout, bout]
              weights are (in, out), biases are (1, out)
    returns : (N, d_out) float32
    """
    N, d_in = x.shape
    hidden = params[0].shape[1]
    hidden_pad = max(128, _round_up(hidden, 128))

    if tile_m is None:
        # Big tiles (amortize ~0.35us/step), but keep the grid >= 2 so both
        # TensorCores get work on v7x.
        tile_m = max(128, min(2048, _round_up((N + 1) // 2, 128)))
    n_tiles = pl.cdiv(N, tile_m)
    n_pad = n_tiles * tile_m

    tparams, n_res, d_in, d_out = _prepare_params(params, hidden_pad, compute_dtype)

    # Lane-major input: batch along the 128-lane axis, zero-padded to n_pad.
    xt = jnp.zeros((d_in, n_pad), jnp.float32).at[:, :N].set(x.T.astype(jnp.float32))

    kernel = functools.partial(_pinn_mlp_kernel, n_res, d_in, d_out)

    in_specs = [pl.BlockSpec((d_in, tile_m), lambda i: (0, i))]
    # Weights/biases: full blocks, constant index map (resident across steps).
    # (pl.Buffered(1) on these would halve their VMEM residency; skipped here
    #  since the whole parameter set is ~100 KB.)
    for p in tparams:
        in_specs.append(pl.BlockSpec(p.shape, lambda i: (0, 0)))

    out = pl.pallas_call(
        kernel,
        out_shape=jax.ShapeDtypeStruct((d_out, n_pad), jnp.float32),
        grid_spec=pltpu.PrefetchScalarGridSpec(
            num_scalar_prefetch=0,
            grid=(n_tiles,),
            in_specs=in_specs,
            # Lane-dense output block: unmasked full-lane stores.
            out_specs=pl.BlockSpec((d_out, tile_m), lambda i: (0, i)),
        ),
        compiler_params=pltpu.CompilerParams(
            dimension_semantics=("parallel",),
        ),
    )(xt, *tparams)

    return out[:, :N].T  # back to (N, d_out)


# ----------------------------------------------------------------------------
# Deterministic parameter construction (matches module __init__ shapes)
# ----------------------------------------------------------------------------
def init_params(layers, key):
    """layers e.g. [1, 64, 64, 64, 1] -> residual network with len(layers)-3 blocks."""
    d_in, hidden, d_out = layers[0], layers[1], layers[-1]
    n_res_blocks = len(layers) - 3

    def linear(key, fan_in, fan_out):
        k1, k2 = jax.random.split(key)
        bound = 1.0 / jnp.sqrt(fan_in)  # torch.nn.Linear default init range
        w = jax.random.uniform(k1, (fan_in, fan_out), jnp.float32, -bound, bound)
        b = jax.random.uniform(k2, (1, fan_out), jnp.float32, -bound, bound)
        return w, b

    params = []
    key, sub = jax.random.split(key)
    params.extend(linear(sub, d_in, hidden))
    for _ in range(n_res_blocks):
        key, s1 = jax.random.split(key)
        key, s2 = jax.random.split(key)
        params.extend(linear(s1, hidden, hidden))
        params.extend(linear(s2, hidden, hidden))
    key, sub = jax.random.split(key)
    params.extend(linear(sub, hidden, d_out))
    return params


# Pure-JAX reference (mirrors torch forward) for a correctness check.
def reference_forward(x, params):
    n_res_blocks = (len(params) - 4) // 4
    h = jnp.tanh(x @ params[0] + params[1])
    idx = 2
    for _ in range(n_res_blocks):
        w1, b1, w2, b2 = params[idx:idx + 4]
        idx += 4
        t = jnp.tanh(h @ w1 + b1)
        t = t @ w2 + b2
        h = jnp.tanh(t + h)
    return h @ params[idx] + params[idx + 1]


if __name__ == "__main__":
    # Architecture: 1-D GPE coordinate in, hidden 64, two residual blocks,
    # scalar perturbation out.
    layers = [1, 64, 64, 64, 1]

    key = jax.random.PRNGKey(0)
    key, pkey, xkey = jax.random.split(key, 3)

    params = init_params(layers, pkey)

    N = 512  # batch of collocation points; tile_m=256 -> grid of 2 tiles
    x = jax.random.uniform(xkey, (N, layers[0]), jnp.float32, 0.0, 1.0)

    ref = reference_forward(x, params)

    # f32 path (default): strict-ish check (tolerance covers matmul-precision
    # mode differences between Mosaic and XLA).
    out = jax.block_until_ready(pinn_forward(x, params, tile_m=256))
    assert out.shape == (N, layers[-1])
    assert float(jnp.max(jnp.abs(out - ref))) < 2e-2, "f32 kernel mismatch vs reference"

    # bf16 matmul-operand path (v6e/v7x fast path; tanh & accumulation stay f32).
    out_bf16 = jax.block_until_ready(
        pinn_forward(x, params, tile_m=256, compute_dtype=jnp.bfloat16))
    assert float(jnp.max(jnp.abs(out_bf16 - ref))) < 8e-2, "bf16 kernel mismatch vs reference"

    # TODO(synk): pde_loss / boundary_loss / normalization_loss need autograd of
    # the network w.r.t. inputs; they are training-time losses, not part of the
    # module's forward pass, so they are not implemented as Pallas kernels here.
    print("KERNEL_OK")
</pallas_src>

<mosaic_0001>
module attributes {stable_mosaic.version = 11 : i64} {
  func.func @_pinn_mlp_kernel(%arg0: i32, %arg1: memref<1x256xf32, #tpu.memory_space<vmem>>, %arg2: memref<128x1xf32, #tpu.memory_space<vmem>>, %arg3: memref<128x1xf32, #tpu.memory_space<vmem>>, %arg4: memref<128x128xf32, #tpu.memory_space<vmem>>, %arg5: memref<128x1xf32, #tpu.memory_space<vmem>>, %arg6: memref<128x128xf32, #tpu.memory_space<vmem>>, %arg7: memref<128x1xf32, #tpu.memory_space<vmem>>, %arg8: memref<128x128xf32, #tpu.memory_space<vmem>>, %arg9: memref<128x1xf32, #tpu.memory_space<vmem>>, %arg10: memref<128x128xf32, #tpu.memory_space<vmem>>, %arg11: memref<128x1xf32, #tpu.memory_space<vmem>>, %arg12: memref<128x1xf32, #tpu.memory_space<vmem>>, %arg13: memref<1x1xf32, #tpu.memory_space<vmem>>, %arg14: memref<1x256xf32, #tpu.memory_space<vmem>>) attributes {dimension_semantics = [#tpu.dimension_semantics<parallel>], iteration_bounds = array<i64: 2>, scalar_prefetch = 0 : i64, scratch_operands = 0 : i64, tpu.core_type = #tpu.core_type<tc>, window_params = [{transform_indices = @transform_0, window_bounds = array<i64: 1, 256>}, {pipeline_mode = #tpu.pipeline_mode<synchronous>, transform_indices = @transform_1, window_bounds = array<i64: 128, 1>}, {pipeline_mode = #tpu.pipeline_mode<synchronous>, transform_indices = @transform_2, window_bounds = array<i64: 128, 1>}, {pipeline_mode = #tpu.pipeline_mode<synchronous>, transform_indices = @transform_3, window_bounds = array<i64: 128, 128>}, {pipeline_mode = #tpu.pipeline_mode<synchronous>, transform_indices = @transform_4, window_bounds = array<i64: 128, 1>}, {pipeline_mode = #tpu.pipeline_mode<synchronous>, transform_indices = @transform_5, window_bounds = array<i64: 128, 128>}, {pipeline_mode = #tpu.pipeline_mode<synchronous>, transform_indices = @transform_6, window_bounds = array<i64: 128, 1>}, {pipeline_mode = #tpu.pipeline_mode<synchronous>, transform_indices = @transform_7, window_bounds = array<i64: 128, 128>}, {pipeline_mode = #tpu.pipeline_mode<synchronous>, transform_indices = @transform_8, window_bounds = array<i64: 128, 1>}, {pipeline_mode = #tpu.pipeline_mode<synchronous>, transform_indices = @transform_9, window_bounds = array<i64: 128, 128>}, {pipeline_mode = #tpu.pipeline_mode<synchronous>, transform_indices = @transform_10, window_bounds = array<i64: 128, 1>}, {pipeline_mode = #tpu.pipeline_mode<synchronous>, transform_indices = @transform_11, window_bounds = array<i64: 128, 1>}, {pipeline_mode = #tpu.pipeline_mode<synchronous>, transform_indices = @transform_12, window_bounds = array<i64: 1, 1>}, {transform_indices = @transform_13, window_bounds = array<i64: 1, 256>}]} {
    %c0 = arith.constant 0 : index
    %c0_0 = arith.constant 0 : index
    %0 = vector.load %arg1[%c0, %c0_0] : memref<1x256xf32, #tpu.memory_space<vmem>>, vector<1x256xf32>
    %c0_1 = arith.constant 0 : index
    %c0_2 = arith.constant 0 : index
    %1 = vector.load %arg2[%c0_1, %c0_2] : memref<128x1xf32, #tpu.memory_space<vmem>>, vector<128x1xf32>
    %c0_3 = arith.constant 0 : index
    %c0_4 = arith.constant 0 : index
    %2 = vector.load %arg3[%c0_3, %c0_4] : memref<128x1xf32, #tpu.memory_space<vmem>>, vector<128x1xf32>
    %3 = vector.broadcast %1 : vector<128x1xf32> to vector<128x256xf32>
    %4 = vector.broadcast %0 : vector<1x256xf32> to vector<128x256xf32>
    %5 = arith.mulf %3, %4 : vector<128x256xf32>
    %6 = vector.broadcast %2 : vector<128x1xf32> to vector<128x256xf32>
    %7 = arith.addf %5, %6 : vector<128x256xf32>
    %8 = math.tanh %7 : vector<128x256xf32>
    %c0_5 = arith.constant 0 : index
    %c0_6 = arith.constant 0 : index
    %9 = vector.load %arg4[%c0_5, %c0_6] : memref<128x128xf32, #tpu.memory_space<vmem>>, vector<128x128xf32>
    %c0_7 = arith.constant 0 : index
    %c0_8 = arith.constant 0 : index
    %10 = vector.load %arg5[%c0_7, %c0_8] : memref<128x1xf32, #tpu.memory_space<vmem>>, vector<128x1xf32>
    %c0_9 = arith.constant 0 : index
    %c0_10 = arith.constant 0 : index
    %11 = vector.load %arg6[%c0_9, %c0_10] : memref<128x128xf32, #tpu.memory_space<vmem>>, vector<128x128xf32>
    %c0_11 = arith.constant 0 : index
    %c0_12 = arith.constant 0 : index
    %12 = vector.load %arg7[%c0_11, %c0_12] : memref<128x1xf32, #tpu.memory_space<vmem>>, vector<128x1xf32>
    %cst = arith.constant dense<0.000000e+00> : vector<128x256xf32>
    %13 = tpu.matmul %9, %8, %cst {dimension_numbers = #tpu.dot_dimension_numbers<[1], [0], [0], [1], [0, 0, 1, 1], [], []>} : vector<128x128xf32>, vector<128x256xf32>, vector<128x256xf32> -> vector<128x256xf32>
    %14 = vector.broadcast %10 : vector<128x1xf32> to vector<128x256xf32>
    %15 = arith.addf %13, %14 : vector<128x256xf32>
    %16 = math.tanh %15 : vector<128x256xf32>
    %cst_13 = arith.constant dense<0.000000e+00> : vector<128x256xf32>
    %17 = tpu.matmul %11, %16, %cst_13 {dimension_numbers = #tpu.dot_dimension_numbers<[1], [0], [0], [1], [0, 0, 1, 1], [], []>} : vector<128x128xf32>, vector<128x256xf32>, vector<128x256xf32> -> vector<128x256xf32>
    %18 = vector.broadcast %12 : vector<128x1xf32> to vector<128x256xf32>
    %19 = arith.addf %17, %18 : vector<128x256xf32>
    %20 = arith.addf %19, %8 : vector<128x256xf32>
    %21 = math.tanh %20 : vector<128x256xf32>
    %c0_14 = arith.constant 0 : index
    %c0_15 = arith.constant 0 : index
    %22 = vector.load %arg8[%c0_14, %c0_15] : memref<128x128xf32, #tpu.memory_space<vmem>>, vector<128x128xf32>
    %c0_16 = arith.constant 0 : index
    %c0_17 = arith.constant 0 : index
    %23 = vector.load %arg9[%c0_16, %c0_17] : memref<128x1xf32, #tpu.memory_space<vmem>>, vector<128x1xf32>
    %c0_18 = arith.constant 0 : index
    %c0_19 = arith.constant 0 : index
    %24 = vector.load %arg10[%c0_18, %c0_19] : memref<128x128xf32, #tpu.memory_space<vmem>>, vector<128x128xf32>
    %c0_20 = arith.constant 0 : index
    %c0_21 = arith.constant 0 : index
    %25 = vector.load %arg11[%c0_20, %c0_21] : memref<128x1xf32, #tpu.memory_space<vmem>>, vector<128x1xf32>
    %cst_22 = arith.constant dense<0.000000e+00> : vector<128x256xf32>
    %26 = tpu.matmul %22, %21, %cst_22 {dimension_numbers = #tpu.dot_dimension_numbers<[1], [0], [0], [1], [0, 0, 1, 1], [], []>} : vector<128x128xf32>, vector<128x256xf32>, vector<128x256xf32> -> vector<128x256xf32>
    %27 = vector.broadcast %23 : vector<128x1xf32> to vector<128x256xf32>
    %28 = arith.addf %26, %27 : vector<128x256xf32>
    %29 = math.tanh %28 : vector<128x256xf32>
    %cst_23 = arith.constant dense<0.000000e+00> : vector<128x256xf32>
    %30 = tpu.matmul %24, %29, %cst_23 {dimension_numbers = #tpu.dot_dimension_numbers<[1], [0], [0], [1], [0, 0, 1, 1], [], []>} : vector<128x128xf32>, vector<128x256xf32>, vector<128x256xf32> -> vector<128x256xf32>
    %31 = vector.broadcast %25 : vector<128x1xf32> to vector<128x256xf32>
    %32 = arith.addf %30, %31 : vector<128x256xf32>
    %33 = arith.addf %32, %21 : vector<128x256xf32>
    %34 = math.tanh %33 : vector<128x256xf32>
    %c0_24 = arith.constant 0 : index
    %c0_25 = arith.constant 0 : index
    %35 = vector.load %arg12[%c0_24, %c0_25] : memref<128x1xf32, #tpu.memory_space<vmem>>, vector<128x1xf32>
    %c0_26 = arith.constant 0 : index
    %c0_27 = arith.constant 0 : index
    %36 = vector.load %arg13[%c0_26, %c0_27] : memref<1x1xf32, #tpu.memory_space<vmem>>, vector<1x1xf32>
    %37 = vector.broadcast %35 : vector<128x1xf32> to vector<128x256xf32>
    %38 = arith.mulf %34, %37 : vector<128x256xf32>
    %cst_28 = arith.constant dense<0.000000e+00> : vector<256xf32>
    %39 = vector.multi_reduction <add>, %38, %cst_28 [0] : vector<128x256xf32> to vector<256xf32>
    %40 = vector.shape_cast %39 : vector<256xf32> to vector<1x256xf32>
    %41 = vector.broadcast %36 : vector<1x1xf32> to vector<1x256xf32>
    %42 = arith.addf %40, %41 : vector<1x256xf32>
    %c0_29 = arith.constant 0 : index
    %c0_30 = arith.constant 0 : index
    %43 = vector.load %arg14[%c0_29, %c0_30] : memref<1x256xf32, #tpu.memory_space<vmem>>, vector<1x256xf32>
    tpu.vector_store %arg14[%c0_29, %c0_30], %42 {strides = array<i32>} : memref<1x256xf32, #tpu.memory_space<vmem>>, vector<1x256xf32>,
    return
  }
  func.func @transform_0(%arg0: i32) -> (i32, i32) {
    %c0_i32 = arith.constant 0 : i32
    %c0_i32_0 = arith.constant 0 : i32
    return %c0_i32, %arg0 : i32, i32
  }
  func.func @transform_1(%arg0: i32) -> (i32, i32) {
    %c0_i32 = arith.constant 0 : i32
    %c0_i32_0 = arith.constant 0 : i32
    %c0_i32_1 = arith.constant 0 : i32
    return %c0_i32, %c0_i32_0 : i32, i32
  }
  func.func @transform_2(%arg0: i32) -> (i32, i32) {
    %c0_i32 = arith.constant 0 : i32
    %c0_i32_0 = arith.constant 0 : i32
    %c0_i32_1 = arith.constant 0 : i32
    return %c0_i32, %c0_i32_0 : i32, i32
  }
  func.func @transform_3(%arg0: i32) -> (i32, i32) {
    %c0_i32 = arith.constant 0 : i32
    %c0_i32_0 = arith.constant 0 : i32
    %c0_i32_1 = arith.constant 0 : i32
    return %c0_i32, %c0_i32_0 : i32, i32
  }
  func.func @transform_4(%arg0: i32) -> (i32, i32) {
    %c0_i32 = arith.constant 0 : i32
    %c0_i32_0 = arith.constant 0 : i32
    %c0_i32_1 = arith.constant 0 : i32
    return %c0_i32, %c0_i32_0 : i32, i32
  }
  func.func @transform_5(%arg0: i32) -> (i32, i32) {
    %c0_i32 = arith.constant 0 : i32
    %c0_i32_0 = arith.constant 0 : i32
    %c0_i32_1 = arith.constant 0 : i32
    return %c0_i32, %c0_i32_0 : i32, i32
  }
  func.func @transform_6(%arg0: i32) -> (i32, i32) {
    %c0_i32 = arith.constant 0 : i32
    %c0_i32_0 = arith.constant 0 : i32
    %c0_i32_1 = arith.constant 0 : i32
    return %c0_i32, %c0_i32_0 : i32, i32
  }
  func.func @transform_7(%arg0: i32) -> (i32, i32) {
    %c0_i32 = arith.constant 0 : i32
    %c0_i32_0 = arith.constant 0 : i32
    %c0_i32_1 = arith.constant 0 : i32
    return %c0_i32, %c0_i32_0 : i32, i32
  }
  func.func @transform_8(%arg0: i32) -> (i32, i32) {
    %c0_i32 = arith.constant 0 : i32
    %c0_i32_0 = arith.constant 0 : i32
    %c0_i32_1 = arith.constant 0 : i32
    return %c0_i32, %c0_i32_0 : i32, i32
  }
  func.func @transform_9(%arg0: i32) -> (i32, i32) {
    %c0_i32 = arith.constant 0 : i32
    %c0_i32_0 = arith.constant 0 : i32
    %c0_i32_1 = arith.constant 0 : i32
    return %c0_i32, %c0_i32_0 : i32, i32
  }
  func.func @transform_10(%arg0: i32) -> (i32, i32) {
    %c0_i32 = arith.constant 0 : i32
    %c0_i32_0 = arith.constant 0 : i32
    %c0_i32_1 = arith.constant 0 : i32
    return %c0_i32, %c0_i32_0 : i32, i32
  }
  func.func @transform_11(%arg0: i32) -> (i32, i32) {
    %c0_i32 = arith.constant 0 : i32
    %c0_i32_0 = arith.constant 0 : i32
    %c0_i32_1 = arith.constant 0 : i32
    return %c0_i32, %c0_i32_0 : i32, i32
  }
  func.func @transform_12(%arg0: i32) -> (i32, i32) {
    %c0_i32 = arith.constant 0 : i32
    %c0_i32_0 = arith.constant 0 : i32
    %c0_i32_1 = arith.constant 0 : i32
    return %c0_i32, %c0_i32_0 : i32, i32
  }
  func.func @transform_13(%arg0: i32) -> (i32, i32) {
    %c0_i32 = arith.constant 0 : i32
    %c0_i32_0 = arith.constant 0 : i32
    return %c0_i32, %arg0 : i32, i32
  }
}

</mosaic_0001>

<bundles_post_ra>
// kernel: tpu_custom_call.1
= control target key start
LH: loop header
LB: loop body
LE: loop exit
PB: predicated region body
PF: predicated region fallthrough
CT: control target
= control target key end

     0   :  { %s3984_s0 = inlined_call_operand.vmem [shape: f32[1,512], index: 0, kind: input, shape index: {}]   ;;  %s3985_s1 = inlined_call_operand.vmem [shape: f32[128,1], index: 1, kind: input, shape index: {}]   ;;  %s3986_s2 = inlined_call_operand.vmem [shape: f32[128,1], index: 2, kind: input, shape index: {}]   ;;  %s3987_s3 = inlined_call_operand.vmem [shape: f32[128,128], index: 3, kind: input, shape index: {}]   ;;  %s3988_s4 = inlined_call_operand.vmem [shape: f32[128,1], index: 4, kind: input, shape index: {}]   ;;  %s3989_s5 = inlined_call_operand.vmem [shape: f32[128,128], index: 5, kind: input, shape index: {}]   ;;  %s3990_s6 = inlined_call_operand.vmem [shape: f32[128,1], index: 6, kind: input, shape index: {}]   ;;  %s3991_s7 = inlined_call_operand.vmem [shape: f32[128,128], index: 7, kind: input, shape index: {}]   ;;  %s3992_s8 = inlined_call_operand.vmem [shape: f32[128,1], index: 8, kind: input, shape index: {}]   ;;  %s3993_s9 = inlined_call_operand.vmem [shape: f32[128,128], index: 9, kind: input, shape index: {}]   ;;  %s3994_s10 = inlined_call_operand.vmem [shape: f32[128,1], index: 10, kind: input, shape index: {}]   ;;  %s3995_s11 = inlined_call_operand.vmem [shape: f32[128,1], index: 11, kind: input, shape index: {}]   ;;  %s3996_s12 = inlined_call_operand.<no memory space> [shape: f32[1,1], index: 12, kind: input, shape index: {}]   ;;  %s3997_s13 = inlined_call_operand.hbm [shape: f32[1,512], index: 13, kind: output, shape index: {}]  }
   0x1   :  { %3998 = sst [smem:[#allocation7_spill]] %s3985_s1  ;;  %v18_v0 = vstv %s3996_s12 }
   0x2   :  { %3999 = sst [smem:[#allocation8_spill]] %s3986_s2  ;;  %19 = vst [vmem:[#allocation2] sm:$0x1] %v18_v0 }
   0x3   :  { %20 = vsyncpa [#allocation4], 0 }
   0x4   :  { %22 = vsyncpa [#allocation4 + $0x1], 0  ;;  %s2946_s27 = smov 0   ;;  %s2948_s28 = smov 0  }
   0x5   :  { %s2950_s29 = smov 0   ;;  %s2952_s30 = smov 0  }
   0x6 LB: > { %s2967_s12 = sadd.s32 4294967295, %s2867_s30   ;;  %s2301_s14 = sadd.s32 4294967294, %s2867_s30   ;;  %s2867_s30 = sphi %s2952_s30, %s4009_s30   ;;  %s2863_s29 = sphi %s2950_s29, %s4008_s29   ;;  %s2859_s28 = sphi %s2948_s28, %s4007_s28   ;;  %s2855_s27 = sphi %s2946_s27, %s4006_s27  }
   0x7   : > { %s2971_s15 = sadd.s32 1, %s2867_s30   ;;  %s313_s16 = sadd.s32 1, %s2863_s29 }
   0x8   : > { %s310_s17 = ssub.s32 %s2867_s30, %s2971_s15  ;;  %p323_p0 = scmp.ne.s32.totalorder %s2863_s29, %s2859_s28 }
   0x9   : > { %p311_p1 = scmp.eq.s32.totalorder %s310_s17, 0  ;;  %p324_p2 = scmp.eq.s32.totalorder %s2967_s12, 1 }
   0xa   : > { %p329_p3 = scmp.ne.s32.totalorder %s2859_s28, %s2855_s27  ;;  %p330_p4 = scmp.eq.s32.totalorder %s2301_s14, 1 }
   0xb   : > { %s2982_s18 = scalar_select %p311_p1, %s2863_s29, %s313_s16  }
   0xc   : > { %p2984_p5 = por %p324_p2, %p323_p0  ;;  %p2988_p6 = por %p330_p4, %p329_p3 }
   0xd   : > { %4000 = sst [smem:[#allocation6_spill]] %s2982_s18  ;;  %p2304_p7 = scmp.ge.s32.totalorder %s2867_s30, 1 }
   0xe   : > { %p392_p8 = scmp.lt.s32.totalorder %s2867_s30, 3 }
  0x10   : > { %p393_p9 = pnand %p2304_p7, %p392_p8 }
  0x11   : > { %s4003_s2 = sld [smem:[#allocation8_spill]] (!%p393_p9)  ;;  %s4004_s1 = sld [smem:[#allocation7_spill]] (!%p393_p9)  ;;  %v2869_v3 = vmov (!%p393_p9), 0   ;;  %v758_v34 = vld [vmem:[%s3988_s4 + $0x8] sm:$0xff] (!%p393_p9)  ;;  %v757_v35 = vld [vmem:[%s3988_s4] sm:$0xff] (!%p393_p9)  ;;  %v760_v36 = vld [vmem:[%s3988_s4 + $0x18] sm:$0xff] (!%p393_p9)  ;;  %v555_v61 = vlaneseq (!%p393_p9) }
  0x12   : > { %396 = sbr.rel (%p393_p9) target bundleno = 1438 (0x59e), region = 72  ;;  %2484 = vset.pattern.permute.xlu1 (!%p393_p9), %v2869_v3  ;;  %2483 = vset.pattern.permute.xlu0 (!%p393_p9), %v2869_v3  ;;  %v759_v37 = vld [vmem:[%s3988_s4 + $0x10] sm:$0xff] (!%p393_p9)  ;;  %v762_v38 = vld [vmem:[%s3988_s4 + $0x28] sm:$0xff] (!%p393_p9)  ;;  %v761_v39 = vld [vmem:[%s3988_s4 + $0x20] sm:$0xff] (!%p393_p9)  ;;  %v2870_v46 = vmov (!%p393_p9), 0.0   ;;  %s2306_s18 = sshll.u32 (!%p393_p9), %s2967_s12, 1 }
  0x13   : > { %v764_v40 = vld [vmem:[%s3988_s4 + $0x38] sm:$0xff] (!%p393_p9)  ;;  %v763_v41 = vld [vmem:[%s3988_s4 + $0x30] sm:$0xff] (!%p393_p9)  ;;  %v766_v42 = vld [vmem:[%s3988_s4 + $0x48] sm:$0xff] (!%p393_p9)  ;;  %949 = vmatprep.mubr.f32.mxu0 (!%p393_p9), %v2870_v46  ;;  %1222 = vmatprep.mubr.f32.mxu1 (!%p393_p9), %v2870_v46  ;;  %p436_p10 = scmp.lt.s32.totalorder (!%p393_p9), %s2306_s18, 3  ;;  %v3178_v0 = vshrl.u32 (!%p393_p9), %v555_v61, 7  ;;  %s432_s16 = sand.u32 (!%p393_p9), 1, %s2859_s28  }
  0x14   : > { %v765_v43 = vld [vmem:[%s3988_s4 + $0x40] sm:$0xff] (!%p393_p9)  ;;  %v768_v44 = vld [vmem:[%s3988_s4 + $0x58] sm:$0xff] (!%p393_p9)  ;;  %v767_v45 = vld [vmem:[%s3988_s4 + $0x50] sm:$0xff] (!%p393_p9)  ;;  %s2312_s21 = sshll.u32 (!%p393_p9), %s2967_s12, 5  ;;  %vm2227_vm0 = vcmp.lt.s32.totalorder (!%p393_p9), %v555_v61, 256  ;;  %s2872_s12 = smov (!%p393_p9), [#allocation3]  }
  0x15   : > { %v770_v47 = vld [vmem:[%s3988_s4 + $0x68] sm:$0xff] (!%p393_p9)  ;;  %v769_v48 = vld [vmem:[%s3988_s4 + $0x60] sm:$0xff] (!%p393_p9)  ;;  %v772_v49 = vld [vmem:[%s3988_s4 + $0x78] sm:$0xff] (!%p393_p9)  ;;  %v557_v3 = vsub.s32 (!%p393_p9), 0, %v3178_v0  ;;  %s3942_s25 = scalar_lea.hbm (!%p393_p9), %s3997_s13, %s2312_s21  ;;  %s2809_s26 = sshll.u32 (!%p393_p9), %s2872_s12, 4  ;;  %s2810_s26 = int_to_ptr.vmem [resolvable:$false] %s2809_s26 }
  0x16   : > { %v771_v50 = vld [vmem:[%s3988_s4 + $0x70] sm:$0xff] (!%p393_p9)  ;;  %v790_v51 = vld [vmem:[%s3990_s6 + $0x8] sm:$0xff] (!%p393_p9)  ;;  %v789_v52 = vld [vmem:[%s3990_s6] sm:$0xff] (!%p393_p9)  ;;  %s2811_s14 = scalar_lea.vmem (!%p393_p9), %s2810_s26, 64 }
  0x17   : > { %v458_v1 = vld [vmem:[%s4003_s2] sm:$0xff] (!%p393_p9)  ;;  %v459_v4 = vld [vmem:[%s4003_s2 + $0x8] sm:$0xff] (!%p393_p9)  ;;  %v445_v6 = vld [vmem:[%s4004_s1 + $0x18] sm:$0xff] (!%p393_p9) }
  0x18   : > { %v442_v2 = vld [vmem:[%s4004_s1] sm:$0xff] (!%p393_p9)  ;;  %599 = vperm.xlu1 (!%p393_p9), %2484, %v458_v1   ;;  %v443_v5 = vld [vmem:[%s4004_s1 + $0x8] sm:$0xff] (!%p393_p9)  ;;  %v444_v7 = vld [vmem:[%s4004_s1 + $0x10] sm:$0xff] (!%p393_p9) }
  0x19   : > { %476 = vperm.xlu0 %2483, %v442_v2   ;;  %v461_v8 = vld [vmem:[%s4003_s2 + $0x18] sm:$0xff]  ;;  %v460_v9 = vld [vmem:[%s4003_s2 + $0x10] sm:$0xff]  ;;  %v447_v10 = vld [vmem:[%s4004_s1 + $0x28] sm:$0xff]  ;;  %s4011_s18 = smov (!%p436_p10, %s2306_s18), 3 }
  0x1a   : > { %v446_v11 = vld [vmem:[%s4004_s1 + $0x20] sm:$0xff]  ;;  %v463_v12 = vld [vmem:[%s4003_s2 + $0x28] sm:$0xff]  ;;  %v449_v14 = vld [vmem:[%s4004_s1 + $0x38] sm:$0xff]  ;;  %s438_s17 = scalar_lea.vmem %s3984_s0, %s4011_s18 }
  0x1b   : > { %v462_v13 = vld [vmem:[%s4003_s2 + $0x20] sm:$0xff]  ;;  %v448_v15 = vld [vmem:[%s4004_s1 + $0x30] sm:$0xff]  ;;  %v465_v16 = vld [vmem:[%s4003_s2 + $0x38] sm:$0xff] }
  0x1c   : > { %604 = vperm.xlu1 %2484, %v459_v4   ;;  %v464_v17 = vld [vmem:[%s4003_s2 + $0x30] sm:$0xff]  ;;  %v451_v18 = vld [vmem:[%s4004_s1 + $0x48] sm:$0xff]  ;;  %v450_v19 = vld [vmem:[%s4004_s1 + $0x40] sm:$0xff] }
  0x1d   : > { %481 = vperm.xlu0 %2483, %v443_v5   ;;  %v467_v20 = vld [vmem:[%s4003_s2 + $0x48] sm:$0xff]  ;;  %v466_v21 = vld [vmem:[%s4003_s2 + $0x40] sm:$0xff]  ;;  %v453_v22 = vld [vmem:[%s4004_s1 + $0x58] sm:$0xff] }
  0x1e   : > { %v452_v23 = vld [vmem:[%s4004_s1 + $0x50] sm:$0xff]  ;;  %v469_v24 = vld [vmem:[%s4003_s2 + $0x58] sm:$0xff]  ;;  %v455_v26 = vld [vmem:[%s4004_s1 + $0x68] sm:$0xff] }
  0x1f   : > { %v468_v25 = vld [vmem:[%s4003_s2 + $0x50] sm:$0xff]  ;;  %v454_v27 = vld [vmem:[%s4004_s1 + $0x60] sm:$0xff]  ;;  %v471_v28 = vld [vmem:[%s4003_s2 + $0x68] sm:$0xff] }
  0x20   : > { %491 = vperm.xlu1 %2484, %v445_v6   ;;  %v470_v29 = vld [vmem:[%s4003_s2 + $0x60] sm:$0xff]  ;;  %v457_v30 = vld [vmem:[%s4004_s1 + $0x78] sm:$0xff]  ;;  %v456_v31 = vld [vmem:[%s4004_s1 + $0x70] sm:$0xff]  ;;  %s2231_s1 = scalar_lea.sflag [#allocation4], %s432_s16 }
  0x21   : > { %486 = vperm.xlu0 %2483, %v444_v7   ;;  %v473_v32 = vld [vmem:[%s4003_s2 + $0x78] sm:$0xff]  ;;  %v472_v33 = vld [vmem:[%s4003_s2 + $0x70] sm:$0xff]  ;;  %v794_v55 = vld [vmem:[%s3990_s6 + $0x28] sm:$0xff]  ;;  %v561_v7 = vsub.s32 1, %v3178_v0 }
  0x22   : > { %v792_v53 = vld [vmem:[%s3990_s6 + $0x18] sm:$0xff]  ;;  %v791_v54 = vld [vmem:[%s3990_s6 + $0x10] sm:$0xff]  ;;  %v793_v56 = vld [vmem:[%s3990_s6 + $0x20] sm:$0xff] }
  0x23   : > { %v796_v57 = vld [vmem:[%s3990_s6 + $0x38] sm:$0xff]  ;;  %v795_v58 = vld [vmem:[%s3990_s6 + $0x30] sm:$0xff]  ;;  %v798_v59 = vld [vmem:[%s3990_s6 + $0x48] sm:$0xff] }
  0x24   : > { %614 = vperm.xlu1 %2484, %v461_v8   ;;  %v797_v60 = vld [vmem:[%s3990_s6 + $0x40] sm:$0xff]  ;;  %v800_v62 = vld [vmem:[%s3990_s6 + $0x58] sm:$0xff]  ;;  %v799_v63 = vld [vmem:[%s3990_s6 + $0x50] sm:$0xff] }
  0x25   : > { %609 = vperm.xlu0 %2483, %v460_v9   ;;  %v802_v1 = vld [vmem:[%s3990_s6 + $0x68] sm:$0xff]  ;;  %v801_v2 = vld [vmem:[%s3990_s6 + $0x60] sm:$0xff]  ;;  %v804_v4 = vld [vmem:[%s3990_s6 + $0x78] sm:$0xff] }
  0x26   : > { %v803_v5 = vld [vmem:[%s3990_s6 + $0x70] sm:$0xff]  ;;  %v441_v6 = vld [vmem:[%s438_s17] sm:$0x3]  ;;  %v1400_v9 = vld [vmem:[%s3992_s8 + $0x8] sm:$0xff]  ;;  %s2305_s17 = sshll.u32 %s432_s16, 1 }
  0x27   : > { %v3199_v8 = vrot.slane %v441_v6, %v557_v3  ;;  %s434_s22 = scalar_lea.vmem [#allocation3], %s2305_s17 }
  0x28   : > { %501 = vperm.xlu1 %2484, %v447_v10   ;;  %v1399_v10 = vld [vmem:[%s3992_s8] sm:$0xff]  ;;  %s2245_s18 = sshll.u32 %s434_s22, 4  ;;  %s3944_s18 = int_to_ptr.vmem [resolvable:$true] %s2245_s18 }
  0x29   : > { %496 = vperm.xlu0 %2483, %v446_v11   ;;  %v3207_v11 = vrot.slane %v441_v6, %v561_v7  ;;  %s2805_s2 = scalar_lea.vmem %s3944_s18, 32  ;;  %p2812_p0 = scmp.lt.s32.totalorder %s3944_s18, %s2810_s26 }
  0x2a   : > { %p2806_p11 = scmp.ne.s32.totalorder %s3944_s18, %s2805_s2  ;;  %p2813_p1 = scmp.lt.s32.totalorder %s2811_s14, %s2805_s2 }
  0x2c   : > { %624 = vperm.xlu1 %2484, %v463_v12   ;;  %p2807_p12 = pnand %p2806_p11, %p2984_p5  ;;  %p2814_p2 = por %p2813_p1, %p2812_p0 }
  0x2d   : > { %619 = vperm.xlu0 %2483, %v462_v13  }
  0x2e   : > { %p2808_p13 = pneg %p2807_p12 }
  0x30   : > { %511 = vperm.xlu1 %2484, %v449_v14   ;;  %p2815_p3 = pnand %p2814_p2, %p2808_p13 }
  0x31   : > { %506 = vperm.xlu0 %2483, %v448_v15   ;;  %v1402_v15 = vld [vmem:[%s3992_s8 + $0x18] sm:$0xff] }
  0x34   : > { %634 = vperm.xlu1 %2484, %v465_v16   ;;  %v1401_v16 = vld [vmem:[%s3992_s8 + $0x10] sm:$0xff] }
  0x35   : > { %629 = vperm.xlu0 %2483, %v464_v17  }
  0x38   : > { %521 = vperm.xlu1 %2484, %v451_v18  }
  0x39   : > { %516 = vperm.xlu0 %2483, %v450_v19  }
  0x3c   : > { %644 = vperm.xlu1 %2484, %v467_v20  }
  0x3d   : > { %639 = vperm.xlu0 %2483, %v466_v21  }
  0x40   : > { %531 = vperm.xlu1 %2484, %v453_v22  }
  0x41   : > { %526 = vperm.xlu0 %2483, %v452_v23   ;;  %v1404_v23 = vld [vmem:[%s3992_s8 + $0x28] sm:$0xff] }
  0x44   : > { %654 = vperm.xlu1 %2484, %v469_v24   ;;  %v1403_v24 = vld [vmem:[%s3992_s8 + $0x20] sm:$0xff] }
  0x45   : > { %649 = vperm.xlu0 %2483, %v468_v25  }
  0x48   : > { %541 = vperm.xlu1 %2484, %v455_v26  }
  0x49   : > { %536 = vperm.xlu0 %2483, %v454_v27  }
  0x4c   : > { %664 = vperm.xlu1 %2484, %v471_v28  }
  0x4d   : > { %659 = vperm.xlu0 %2483, %v470_v29  }
  0x50   : > { %551 = vperm.xlu1 %2484, %v457_v30   ;;  %v1406_v30 = vld [vmem:[%s3992_s8 + $0x38] sm:$0xff] }
  0x51   : > { %546 = vperm.xlu0 %2483, %v456_v31  }
  0x54   : > { %674 = vperm.xlu1 %2484, %v473_v32  }
  0x55   : > { %669 = vperm.xlu0 %2483, %v472_v33  }
  0x58   : > { %812 = vperm.xlu1 %2484, %v758_v34   ;;  %v1405_v34 = vld [vmem:[%s3992_s8 + $0x30] sm:$0xff] }
  0x59   : > { %807 = vperm.xlu0 %2483, %v757_v35  }
  0x5c   : > { %822 = vperm.xlu1 %2484, %v760_v36  }
  0x5d   : > { %817 = vperm.xlu0 %2483, %v759_v37  }
  0x60   : > { %832 = vperm.xlu1 %2484, %v762_v38  }
  0x61   : > { %827 = vperm.xlu0 %2483, %v761_v39  }
  0x64   : > { %842 = vperm.xlu1 %2484, %v764_v40  }
  0x65   : > { %837 = vperm.xlu0 %2483, %v763_v41  }
  0x68   : > { %852 = vperm.xlu1 %2484, %v766_v42   ;;  %v1408_v42 = vld [vmem:[%s3992_s8 + $0x48] sm:$0xff] }
  0x69   : > { %847 = vperm.xlu0 %2483, %v765_v43   ;;  %v1407_v43 = vld [vmem:[%s3992_s8 + $0x40] sm:$0xff] }
  0x6c   : > { %862 = vperm.xlu1 %2484, %v768_v44  }
  0x6d   : > { %857 = vperm.xlu0 %2483, %v767_v45  }
  0x70   : > { %872 = vperm.xlu1 %2484, %v770_v47  }
  0x71   : > { %867 = vperm.xlu0 %2483, %v769_v48   ;;  %v1410_v48 = vld [vmem:[%s3992_s8 + $0x58] sm:$0xff] }
  0x74   : > { %882 = vperm.xlu1 %2484, %v772_v49  }
  0x75   : > { %877 = vperm.xlu0 %2483, %v771_v50  }
  0x78   : > { %1085 = vperm.xlu1 %2484, %v790_v51  }
  0x79   : > { %1080 = vperm.xlu0 %2483, %v789_v52  }
  0x7c   : > { %1095 = vperm.xlu1 %2484, %v792_v53   ;;  %v1409_v53 = vld [vmem:[%s3992_s8 + $0x50] sm:$0xff] }
  0x7d   : > { %1090 = vperm.xlu0 %2483, %v791_v54  }
  0x80   : > { %1105 = vperm.xlu1 %2484, %v794_v55  }
  0x81   : > { %1100 = vperm.xlu0 %2483, %v793_v56  }
  0x84   : > { %1115 = vperm.xlu1 %2484, %v796_v57  }
  0x85   : > { %1110 = vperm.xlu0 %2483, %v795_v58  }
  0x88   : > { %1125 = vperm.xlu1 %2484, %v798_v59  }
  0x89   : > { %1120 = vperm.xlu0 %2483, %v797_v60  }
  0x8c   : > { %1135 = vperm.xlu1 %2484, %v800_v62  }
  0x8d   : > { %1130 = vperm.xlu0 %2483, %v799_v63  }
  0x90   : > { %1145 = vperm.xlu1 %2484, %v802_v1  }
  0x91   : > { %1140 = vperm.xlu0 %2483, %v801_v2  }
  0x94   : > { %1155 = vperm.xlu1 %2484, %v804_v4   ;;  %v1412_v4 = vld [vmem:[%s3992_s8 + $0x68] sm:$0xff] }
  0x95   : > { %1150 = vperm.xlu0 %2483, %v803_v5   ;;  %v1411_v5 = vld [vmem:[%s3992_s8 + $0x60] sm:$0xff] }
  0x97   : > { %v600_v12 = vpop.permute.xlu1 %599 }
  0x98   : > { %v477_v13 = vpop.permute.xlu0 %476  ;;  %1454 = vperm.xlu1 %2484, %v1400_v9  }
  0x99   : > { %v565_v14 = vmul.f32 %v3199_v8, %v477_v13  ;;  %1449 = vperm.xlu0 %2483, %v1399_v10   ;;  %v566_v17 = vmul.f32 %v3207_v11, %v477_v13 }
  0x9b   : > { %v677_v18 = vadd.f32 %v600_v12, %v565_v14  ;;  %v605_v19 = vpop.permute.xlu1 %604  ;;  %v678_v25 = vadd.f32 %v600_v12, %v566_v17  ;;  %v1414_v12 = vld [vmem:[%s3992_s8 + $0x78] sm:$0xff]  ;;  %v1413_v17 = vld [vmem:[%s3992_s8 + $0x70] sm:$0xff] }
  0x9c   : > { %v482_v20 = vpop.permute.xlu0 %481  ;;  %1464 = vperm.xlu1 %2484, %v1402_v15  }
  0x9d   : > { %v567_v21 = vmul.f32 %v3199_v8, %v482_v20  ;;  %v568_v22 = vmul.f32 %v3207_v11, %v482_v20  ;;  %1459 = vperm.xlu0 %2483, %v1401_v16   ;;  %2485 = vtanh.f32 %v677_v18 }
  0x9f   : > { %v679_v26 = vadd.f32 %v605_v19, %v567_v21  ;;  %v680_v27 = vadd.f32 %v605_v19, %v568_v22  ;;  %v492_v28 = vpop.permute.xlu1 %491 }
  0xa0   : > { %v487_v29 = vpop.permute.xlu0 %486  ;;  %1474 = vperm.xlu1 %2484, %v1404_v23   ;;  %v571_v31 = vmul.f32 %v3199_v8, %v492_v28  ;;  %v572_v32 = vmul.f32 %v3207_v11, %v492_v28  ;;  %v1432_v28 = vld [vmem:[%s3994_s10 + $0x8] sm:$0xff] }
  0xa1   : > { %2487 = vtanh.f32 %v679_v26  ;;  %1469 = vperm.xlu0 %2483, %v1403_v24   ;;  %v569_v33 = vmul.f32 %v3199_v8, %v487_v29  ;;  %v570_v35 = vmul.f32 %v3207_v11, %v487_v29  ;;  %v1431_v29 = vld [vmem:[%s3994_s10] sm:$0xff] }
  0xa2   : > { %2489 = vtanh.f32 %v680_v27 }
  0xa3   : > { %2491 = vtanh.f32 %v678_v25  ;;  %v615_v36 = vpop.permute.xlu1 %614 }
  0xa4   : > { %v610_v37 = vpop.permute.xlu0 %609  ;;  %v683_v38 = vadd.f32 %v615_v36, %v571_v31  ;;  %v684_v39 = vadd.f32 %v615_v36, %v572_v32  ;;  %1484 = vperm.xlu1 %2484, %v1406_v30  }
  0xa5   : > { %v681_v40 = vadd.f32 %v610_v37, %v569_v33  ;;  %v682_v41 = vadd.f32 %v610_v37, %v570_v35  ;;  %1479 = vperm.xlu0 %2483, %v1405_v34   ;;  %v1434_v34 = vld [vmem:[%s3994_s10 + $0x18] sm:$0xff] }
  0xa6   : > { %2493 = vtanh.f32 %v683_v38 }
  0xa7   : > { %2495 = vtanh.f32 %v684_v39  ;;  %v502_v44 = vpop.permute.xlu1 %501  ;;  %v3241_v47 = vpop.eup %2485  ;;  %v1433_v39 = vld [vmem:[%s3994_s10 + $0x10] sm:$0xff] }
  0xa8   : > { %v497_v45 = vpop.permute.xlu0 %496  ;;  %2497 = vtanh.f32 %v681_v40  ;;  %1494 = vperm.xlu1 %2484, %v1408_v42   ;;  %v575_v50 = vmul.f32 %v3199_v8, %v502_v44  ;;  %v576_v51 = vmul.f32 %v3207_v11, %v502_v44 }
  0xa9   : > { %2499 = vtanh.f32 %v682_v41  ;;  %1489 = vperm.xlu0 %2483, %v1407_v43   ;;  %v573_v52 = vmul.f32 %v3199_v8, %v497_v45  ;;  %v574_v55 = vmul.f32 %v3207_v11, %v497_v45 }
  0xab   : > { %v3246_v49 = vpop.eup %2487  ;;  %v625_v56 = vpop.permute.xlu1 %624 }
  0xac   : > { %v3254_v54 = vpop.eup %2489  ;;  %v620_v57 = vpop.permute.xlu0 %619  ;;  %v687_v59 = vadd.f32 %v625_v56, %v575_v50  ;;  %v688_v60 = vadd.f32 %v625_v56, %v576_v51  ;;  %1504 = vperm.xlu1 %2484, %v1410_v48   ;;  %v2315_v63 = vpack.c.bf16 %v3246_v49, %v3241_v47 }
  0xad   : > { %v3257_v58 = vpop.eup %2491  ;;  %v685_v62 = vadd.f32 %v620_v57, %v573_v52  ;;  %v686_v1 = vadd.f32 %v620_v57, %v574_v55  ;;  %1499 = vperm.xlu0 %2483, %v1409_v53   ;;  %v1436_v53 = vld [vmem:[%s3994_s10 + $0x28] sm:$0xff]  ;;  %v1435_v55 = vld [vmem:[%s3994_s10 + $0x20] sm:$0xff] }
  0xae   : > { %v2313_v2 = vpack.c.bf16 %v3254_v54, %v3257_v58  ;;  %2501 = vtanh.f32 %v687_v59 }
  0xaf   : > { %2503 = vtanh.f32 %v688_v60  ;;  %v512_v6 = vpop.permute.xlu1 %511 }
  0xb0   : > { %2314 = vmatprep.subr.bf16.mxu0 %v2313_v2  ;;  %v507_v7 = vpop.permute.xlu0 %506  ;;  %v3269_v9 = vpop.eup %2493  ;;  %2505 = vtanh.f32 %v685_v62  ;;  %1514 = vperm.xlu1 %2484, %v1412_v4   ;;  %v579_v14 = vmul.f32 %v3199_v8, %v512_v6  ;;  %v580_v15 = vmul.f32 %v3207_v11, %v512_v6  ;;  %v1438_v62 = vld [vmem:[%s3994_s10 + $0x38] sm:$0xff] }
  0xb1   : > { %2316 = vmatpush1.bf16.msra.mxu0 %v2315_v63  ;;  %v3271_v10 = vpop.eup %2495  ;;  %2507 = vtanh.f32 %v686_v1  ;;  %1509 = vperm.xlu0 %2483, %v1411_v5   ;;  %v577_v16 = vmul.f32 %v3199_v8, %v507_v7  ;;  %v578_v19 = vmul.f32 %v3207_v11, %v507_v7  ;;  %v1437_v5 = vld [vmem:[%s3994_s10 + $0x30] sm:$0xff] }
  0xb2   : > { %v3276_v13 = vpop.eup %2497 }
  0xb3   : > { %v3284_v18 = vpop.eup %2499  ;;  %v635_v20 = vpop.permute.xlu1 %634  ;;  %v2319_v25 = vpack.c.bf16 %v3269_v9, %v3276_v13 }
  0xb4   : > { %v630_v21 = vpop.permute.xlu0 %629  ;;  %v691_v22 = vadd.f32 %v635_v20, %v579_v14  ;;  %v692_v23 = vadd.f32 %v635_v20, %v580_v15  ;;  %1524 = vperm.xlu1 %2484, %v1414_v12   ;;  %v2317_v27 = vpack.c.bf16 %v3271_v10, %v3284_v18 }
  0xb5   : > { %v689_v24 = vadd.f32 %v630_v21, %v577_v16  ;;  %v690_v26 = vadd.f32 %v630_v21, %v578_v19  ;;  %1519 = vperm.xlu0 %2483, %v1413_v17  }
  0xb6   : > { %2509 = vtanh.f32 %v691_v22  ;;  %2318 = vmatprep.subr.bf16.mxu0 %v2317_v27  ;;  %v2025_v22 = vld [vmem:[%s3995_s11] sm:$0xff] }
  0xb7   : > { %2511 = vtanh.f32 %v692_v23  ;;  %v522_v30 = vpop.permute.xlu1 %521  ;;  %2320 = vmatpush1.bf16.msra.mxu0 %v2319_v25  ;;  %v1439_v23 = vld [vmem:[%s3994_s10 + $0x40] sm:$0xff] }
  0xb8   : > { %v517_v31 = vpop.permute.xlu0 %516  ;;  %v3297_v32 = vpop.eup %2501  ;;  %2513 = vtanh.f32 %v689_v24  ;;  %1727 = vperm.xlu1 %2484, %v1432_v28   ;;  %v583_v36 = vmul.f32 %v3199_v8, %v522_v30  ;;  %v584_v37 = vmul.f32 %v3207_v11, %v522_v30  ;;  %v1440_v28 = vld [vmem:[%s3994_s10 + $0x48] sm:$0xff] }
  0xb9   : > { %v3299_v33 = vpop.eup %2503  ;;  %2515 = vtanh.f32 %v690_v26  ;;  %1722 = vperm.xlu0 %2483, %v1431_v29   ;;  %v581_v38 = vmul.f32 %v3199_v8, %v517_v31  ;;  %v582_v41 = vmul.f32 %v3207_v11, %v517_v31 }
  0xba   : > { %v3304_v35 = vpop.eup %2505 }
  0xbb   : > { %v3312_v40 = vpop.eup %2507  ;;  %v645_v42 = vpop.permute.xlu1 %644  ;;  %v2323_v50 = vpack.c.bf16 %v3297_v32, %v3304_v35 }
  0xbc   : > { %v640_v43 = vpop.permute.xlu0 %639  ;;  %v695_v44 = vadd.f32 %v645_v42, %v583_v36  ;;  %v696_v45 = vadd.f32 %v645_v42, %v584_v37  ;;  %1737 = vperm.xlu1 %2484, %v1434_v34   ;;  %v2321_v52 = vpack.c.bf16 %v3299_v33, %v3312_v40  ;;  %v2026_v36 = vld [vmem:[%s3995_s11 + $0x8] sm:$0xff] }
  0xbd   : > { %v693_v48 = vadd.f32 %v640_v43, %v581_v38  ;;  %v694_v51 = vadd.f32 %v640_v43, %v582_v41  ;;  %1732 = vperm.xlu0 %2483, %v1433_v39  }
  0xbe   : > { %2517 = vtanh.f32 %v695_v44  ;;  %2322 = vmatprep.subr.bf16.mxu0 %v2321_v52  ;;  %v2027_v52 = vld [vmem:[%s3995_s11 + $0x10] sm:$0xff] }
  0xbf   : > { %2519 = vtanh.f32 %v696_v45  ;;  %v532_v56 = vpop.permute.xlu1 %531  ;;  %2324 = vmatpush1.bf16.msra.mxu0 %v2323_v50 }
  0xc0   : > { %v527_v57 = vpop.permute.xlu0 %526  ;;  %v3325_v59 = vpop.eup %2509  ;;  %2521 = vtanh.f32 %v693_v48  ;;  %1747 = vperm.xlu1 %2484, %v1436_v53   ;;  %v587_v1 = vmul.f32 %v3199_v8, %v532_v56  ;;  %v588_v2 = vmul.f32 %v3207_v11, %v532_v56 }
  0xc1   : > { %v3327_v60 = vpop.eup %2511  ;;  %2523 = vtanh.f32 %v694_v51  ;;  %1742 = vperm.xlu0 %2483, %v1435_v55   ;;  %v585_v4 = vmul.f32 %v3199_v8, %v527_v57  ;;  %v586_v7 = vmul.f32 %v3207_v11, %v527_v57  ;;  %v1441_v51 = vld [vmem:[%s3994_s10 + $0x50] sm:$0xff] }
  0xc2   : > { %v3332_v63 = vpop.eup %2513 }
  0xc3   : > { %v3340_v6 = vpop.eup %2515  ;;  %v655_v12 = vpop.permute.xlu1 %654  ;;  %v2327_v19 = vpack.c.bf16 %v3325_v59, %v3332_v63 }
  0xc4   : > { %v650_v14 = vpop.permute.xlu0 %649  ;;  %v699_v15 = vadd.f32 %v655_v12, %v587_v1  ;;  %v700_v16 = vadd.f32 %v655_v12, %v588_v2  ;;  %1757 = vperm.xlu1 %2484, %v1438_v62   ;;  %v2325_v21 = vpack.c.bf16 %v3327_v60, %v3340_v6  ;;  %v1442_v62 = vld [vmem:[%s3994_s10 + $0x58] sm:$0xff] }
  0xc5   : > { %v697_v17 = vadd.f32 %v650_v14, %v585_v4  ;;  %v698_v20 = vadd.f32 %v650_v14, %v586_v7  ;;  %1752 = vperm.xlu0 %2483, %v1437_v5   ;;  %v2028_v7 = vld [vmem:[%s3995_s11 + $0x18] sm:$0xff] }
  0xc6   : > { %2525 = vtanh.f32 %v699_v15  ;;  %2326 = vmatprep.subr.bf16.mxu0 %v2325_v21 }
  0xc7   : > { %2527 = vtanh.f32 %v700_v16  ;;  %v542_v24 = vpop.permute.xlu1 %541  ;;  %2328 = vmatpush1.bf16.msra.mxu0 %v2327_v19 }
  0xc8   : > { %v537_v25 = vpop.permute.xlu0 %536  ;;  %v3353_v26 = vpop.eup %2517  ;;  %2529 = vtanh.f32 %v697_v17  ;;  %2044 = vperm.xlu1 %2484, %v2025_v22   ;;  %v591_v30 = vmul.f32 %v3199_v8, %v542_v24  ;;  %v592_v31 = vmul.f32 %v3207_v11, %v542_v24 }
  0xc9   : > { %v3355_v27 = vpop.eup %2519  ;;  %2531 = vtanh.f32 %v698_v20  ;;  %1762 = vperm.xlu0 %2483, %v1439_v23   ;;  %v589_v34 = vmul.f32 %v3199_v8, %v537_v25  ;;  %v590_v38 = vmul.f32 %v3207_v11, %v537_v25  ;;  %v1443_v23 = vld [vmem:[%s3994_s10 + $0x60] sm:$0xff] }
  0xca   : > { %v3360_v29 = vpop.eup %2521 }
  0xcb   : > { %v3368_v37 = vpop.eup %2523  ;;  %v665_v39 = vpop.permute.xlu1 %664  ;;  %v2331_v45 = vpack.c.bf16 %v3353_v26, %v3360_v29 }
  0xcc   : > { %v660_v41 = vpop.permute.xlu0 %659  ;;  %v703_v42 = vadd.f32 %v665_v39, %v591_v30  ;;  %v704_v43 = vadd.f32 %v665_v39, %v592_v31  ;;  %1767 = vperm.xlu1 %2484, %v1440_v28   ;;  %v2329_v50 = vpack.c.bf16 %v3355_v27, %v3368_v37  ;;  %v1444_v28 = vld [vmem:[%s3994_s10 + $0x68] sm:$0xff]  ;;  %v1445_v39 = vld [vmem:[%s3994_s10 + $0x70] sm:$0xff] }
  0xcd   : > { %v701_v44 = vadd.f32 %v660_v41, %v589_v34  ;;  %v702_v48 = vadd.f32 %v660_v41, %v590_v38  ;;  %2049 = vperm.xlu0 %2483, %v2026_v36   ;;  %v2030_v31 = vld [vmem:[%s3995_s11 + $0x28] sm:$0xff]  ;;  %v2031_v41 = vld [vmem:[%s3995_s11 + $0x30] sm:$0xff] }
  0xce   : > { %2533 = vtanh.f32 %v703_v42  ;;  %2330 = vmatprep.subr.bf16.mxu0 %v2329_v50 }
  0xcf   : > { %2535 = vtanh.f32 %v704_v43  ;;  %v552_v53 = vpop.permute.xlu1 %551  ;;  %2332 = vmatpush1.bf16.msra.mxu0 %v2331_v45 }
  0xd0   : > { %v547_v55 = vpop.permute.xlu0 %546  ;;  %v3381_v56 = vpop.eup %2525  ;;  %2537 = vtanh.f32 %v701_v44  ;;  %1772 = vperm.xlu1 %2484, %v1441_v51   ;;  %v595_v2 = vmul.f32 %v3199_v8, %v552_v53  ;;  %v596_v4 = vmul.f32 %v3207_v11, %v552_v53  ;;  %v1446_v44 = vld [vmem:[%s3994_s10 + $0x78] sm:$0xff]  ;;  %v2034_v53 = vld [vmem:[%s3995_s11 + $0x48] sm:$0xff] }
  0xd1   : > { %v3383_v57 = vpop.eup %2527  ;;  %2539 = vtanh.f32 %v702_v48  ;;  %2054 = vperm.xlu0 %2483, %v2027_v52   ;;  %v593_v5 = vmul.f32 %v3199_v8, %v547_v55  ;;  %v594_v14 = vmul.f32 %v3207_v11, %v547_v55  ;;  %v2029_v11 = vld [vmem:[%s3995_s11 + $0x20] sm:$0xff]  ;;  %v2032_v48 = vld [vmem:[%s3995_s11 + $0x38] sm:$0xff] }
  0xd2   : > { %v3388_v1 = vpop.eup %2529  ;;  %v2033_v55 = vld [vmem:[%s3995_s11 + $0x40] sm:$0xff] }
  0xd3   : > { %v3396_v12 = vpop.eup %2531  ;;  %v675_v15 = vpop.permute.xlu1 %674  ;;  %v2335_v21 = vpack.c.bf16 %v3381_v56, %v3388_v1 }
  0xd4   : > { %v670_v16 = vpop.permute.xlu0 %669  ;;  %v707_v17 = vadd.f32 %v675_v15, %v595_v2  ;;  %v708_v19 = vadd.f32 %v675_v15, %v596_v4  ;;  %1777 = vperm.xlu1 %2484, %v1442_v62   ;;  %v2333_v8 = vpack.c.bf16 %v3383_v57, %v3396_v12  ;;  %v741_v62 = vld [vmem:[%s3987_s3] sm:$0xff]  ;;  %v2036_v2 = vld [vmem:[%s3995_s11 + $0x58] sm:$0xff]  ;;  %v2035_v4 = vld [vmem:[%s3995_s11 + $0x50] sm:$0xff] }
  0xd5   : > { %v705_v20 = vadd.f32 %v670_v16, %v593_v5  ;;  %v706_v22 = vadd.f32 %v670_v16, %v594_v14  ;;  %2059 = vperm.xlu0 %2483, %v2028_v7   ;;  %v742_v5 = vld [vmem:[%s3987_s3 + $0x8] sm:$0xff]  ;;  %v2037_v14 = vld [vmem:[%s3995_s11 + $0x60] sm:$0xff]  ;;  %v743_v15 = vld [vmem:[%s3987_s3 + $0x10] sm:$0xff] }
  0xd6   : > { %2541 = vtanh.f32 %v707_v17  ;;  %2334 = vmatprep.subr.bf16.mxu0 %v2333_v8  ;;  %v2038_v7 = vld [vmem:[%s3995_s11 + $0x68] sm:$0xff]  ;;  %v2040_v16 = vld [vmem:[%s3995_s11 + $0x78] sm:$0xff]  ;;  %v2039_v17 = vld [vmem:[%s3995_s11 + $0x70] sm:$0xff] }
  0xd7   : > { %2543 = vtanh.f32 %v708_v19  ;;  %2336 = vmatpush1.bf16.msra.mxu0 %v2335_v21  ;;  %v744_v19 = vld [vmem:[%s3987_s3 + $0x18] sm:$0xff]  ;;  %v745_v21 = vld [vmem:[%s3987_s3 + $0x20] sm:$0xff]  ;;  %v747_v8 = vld [vmem:[%s3987_s3 + $0x30] sm:$0xff] }
  0xd8   : > { %v3409_v24 = vpop.eup %2533  ;;  %2545 = vtanh.f32 %v705_v20  ;;  %1782 = vperm.xlu1 %2484, %v1443_v23   ;;  %v2041_v20 = vld [vmem:[#allocation2] sm:$0x1]  ;;  %v748_v23 = vld [vmem:[%s3987_s3 + $0x38] sm:$0xff] }
  0xd9   : > { %v3411_v25 = vpop.eup %2535  ;;  %2547 = vtanh.f32 %v706_v22  ;;  %2064 = vperm.xlu0 %2483, %v2029_v11   ;;  %v746_v22 = vld [vmem:[%s3987_s3 + $0x28] sm:$0xff]  ;;  %v749_v11 = vld [vmem:[%s3987_s3 + $0x40] sm:$0xff] }
  0xda   : > { %v3416_v30 = vpop.eup %2537 }
  0xdb   : > { %v3421_v34 = vpop.eup %2539  ;;  %v2339_v36 = vpack.c.bf16 %v3409_v24, %v3416_v30 }
  0xdc   : > { %v2337_v38 = vpack.c.bf16 %v3411_v25, %v3421_v34  ;;  %1787 = vperm.xlu1 %2484, %v1444_v28   ;;  %v750_v28 = vld [vmem:[%s3987_s3 + $0x48] sm:$0xff] }
  0xdd   : > { %2069 = vperm.xlu0 %2483, %v2030_v31   ;;  %v751_v31 = vld [vmem:[%s3987_s3 + $0x50] sm:$0xff] }
  0xde   : > { %2338 = vmatprep.subr.bf16.mxu0 %v2337_v38  ;;  %v753_v38 = vld [vmem:[%s3987_s3 + $0x60] sm:$0xff] }
  0xdf   : > { %2340 = vmatpush1.bf16.msra.mxu0 %v2339_v36  ;;  %v752_v36 = vld [vmem:[%s3987_s3 + $0x58] sm:$0xff] }
  0xe0   : > { %v3433_v42 = vpop.eup %2541  ;;  %1792 = vperm.xlu1 %2484, %v1445_v39   ;;  %v754_v39 = vld [vmem:[%s3987_s3 + $0x68] sm:$0xff] }
  0xe1   : > { %v3435_v43 = vpop.eup %2543  ;;  %2074 = vperm.xlu0 %2483, %v2031_v41   ;;  %v755_v41 = vld [vmem:[%s3987_s3 + $0x70] sm:$0xff] }
  0xe2   : > { %v3440_v45 = vpop.eup %2545 }
  0xe3   : > { %v3445_v50 = vpop.eup %2547  ;;  %v2343_v51 = vpack.c.bf16 %v3433_v42, %v3440_v45 }
  0xe4   : > { %v2341_v52 = vpack.c.bf16 %v3435_v43, %v3445_v50  ;;  %1797 = vperm.xlu1 %2484, %v1446_v44   ;;  %v756_v44 = vld [vmem:[%s3987_s3 + $0x78] sm:$0xff] }
  0xe5   : > { %2079 = vperm.xlu0 %2483, %v2032_v48   ;;  %v808_v48 = vpop.permute.xlu0 %807 }
  0xe6   : > { %2342 = vmatprep.subr.bf16.mxu0 %v2341_v52 }
  0xe7   : > { %2344 = vmatpush1.bf16.msra.mxu0 %v2343_v51 }
  0xe8   : > { %2089 = vperm.xlu1 %2484, %v2034_v53  }
  0xe9   : > { %2084 = vperm.xlu0 %2483, %v2033_v55  }
  0xea   : > { %950 = vmatmul.mubr.f32.vlgmr.msra.gmra.mrb[0].mxu0 %v741_v62  ;;  %v813_v62 = vpop.permute.xlu1 %812 }
  0xeb   : > { %955 = vmatprep.mubr.f32.mxu0 %v2870_v46 }
  0xec   : > { %2099 = vperm.xlu1 %2484, %v2036_v2  }
  0xed   : > { %2094 = vperm.xlu0 %2483, %v2035_v4  }
  0xee   : > { %956 = vmatmul.mubr.f32.gmra.mrb[2].mxu0 %v742_v5 }
  0xef   : > { %961 = vmatprep.mubr.f32.mxu0 %v2870_v46 }
  0xf0   : > { %2109 = vperm.xlu1 %2484, %v2038_v7  }
  0xf1   : > { %2104 = vperm.xlu0 %2483, %v2037_v14   ;;  %v818_v14 = vpop.permute.xlu0 %817 }
  0xf2   : > { %962 = vmatmul.mubr.f32.gmra.mrb[4].mxu0 %v743_v15 }
  0xf3   : > { %967 = vmatprep.mubr.f32.mxu0 %v2870_v46 }
  0xf4   : > { %2119 = vperm.xlu1 %2484, %v2040_v16  }
  0xf5   : > { %2114 = vperm.xlu0 %2483, %v2039_v17  }
  0xf6   : > { %968 = vmatmul.mubr.f32.gmra.mrb[6].mxu0 %v744_v19 }
  0xf7   : > { %973 = vmatprep.mubr.f32.mxu0 %v2870_v46 }
  0xf9   : > { %2198 = vperm.xlu0 %2483, %v2041_v20   ;;  %v823_v20 = vpop.permute.xlu1 %822 }
  0xfa   : > { %974 = vmatmul.mubr.f32.gmra.mrb[8].mxu0 %v745_v21 }
  0xfb   : > { %979 = vmatprep.mubr.f32.mxu0 %v2870_v46 }
  0xfe   : > { %980 = vmatmul.mubr.f32.gmra.mrb[10].mxu0 %v746_v22 }
  0xff   : > { %985 = vmatprep.mubr.f32.mxu0 %v2870_v46 }
 0x102   : > { %986 = vmatmul.mubr.f32.gmra.mrb[12].mxu0 %v747_v8 }
 0x103   : > { %991 = vmatprep.mubr.f32.mxu0 %v2870_v46 }
 0x106   : > { %992 = vmatmul.mubr.f32.gmra.mrb[14].mxu0 %v748_v23 }
 0x107   : > { %997 = vmatprep.mubr.f32.mxu0 %v2870_v46 }
 0x10a   : > { %998 = vmatmul.mubr.f32.gmra.mrb[16].mxu0 %v749_v11 }
 0x10b   : > { %1003 = vmatprep.mubr.f32.mxu0 %v2870_v46 }
 0x10e   : > { %1004 = vmatmul.mubr.f32.gmra.mrb[18].mxu0 %v750_v28 }
 0x10f   : > { %1009 = vmatprep.mubr.f32.mxu0 %v2870_v46 }
 0x112   : > { %1010 = vmatmul.mubr.f32.gmra.mrb[20].mxu0 %v751_v31  ;;  %v828_v31 = vpop.permute.xlu0 %827 }
 0x113   : > { %1015 = vmatprep.mubr.f32.mxu0 %v2870_v46 }
 0x116   : > { %1016 = vmatmul.mubr.f32.gmra.mrb[22].mxu0 %v752_v36 }
 0x117   : > { %1021 = vmatprep.mubr.f32.mxu0 %v2870_v46 }
 0x11a   : > { %1022 = vmatmul.mubr.f32.gmra.mrb[24].mxu0 %v753_v38 }
 0x11b   : > { %1027 = vmatprep.mubr.f32.mxu0 %v2870_v46 }
 0x11e   : > { %1028 = vmatmul.mubr.f32.gmra.mrb[26].mxu0 %v754_v39 }
 0x11f   : > { %1033 = vmatprep.mubr.f32.mxu0 %v2870_v46 }
 0x122   : > { %1034 = vmatmul.mubr.f32.gmra.mrb[28].mxu0 %v755_v41 }
 0x123   : > { %1039 = vmatprep.mubr.f32.mxu0 %v2870_v46 }
 0x126   : > { %1040 = vmatmul.mubr.f32.gmra.mrb[30].mxu0 %v756_v44 }
 0x127   : > { %1591 = vmatprep.mubr.f32.mxu0 %v2870_v46 }
 0x1bd   : > { %v951_v51 = vpop.f32.mrb[0].mxu0 }
 0x1be   : > { %v952_v52 = vadd.f32 %v951_v51, %v808_v48  ;;  %v953_v53 = vpop.f32.mrb[1].mxu0 }
 0x1bf   : > { %v954_v55 = vadd.f32 %v953_v53, %v808_v48  ;;  %v833_v53 = vpop.permute.xlu1 %832 }
 0x1c0   : > { %2549 = vtanh.f32 %v952_v52 }
 0x1c1   : > { %v957_v2 = vpop.f32.mrb[2].mxu0  ;;  %2551 = vtanh.f32 %v954_v55 }
 0x1c2   : > { %v958_v4 = vadd.f32 %v957_v2, %v813_v62  ;;  %v959_v5 = vpop.f32.mrb[3].mxu0 }
 0x1c3   : > { %v960_v7 = vadd.f32 %v959_v5, %v813_v62 }
 0x1c4   : > { %2553 = vtanh.f32 %v958_v4 }
 0x1c5   : > { %2555 = vtanh.f32 %v960_v7  ;;  %v963_v15 = vpop.f32.mrb[4].mxu0 }
 0x1c6   : > { %v964_v16 = vadd.f32 %v963_v15, %v818_v14  ;;  %v965_v17 = vpop.f32.mrb[5].mxu0 }
 0x1c7   : > { %v966_v19 = vadd.f32 %v965_v17, %v818_v14  ;;  %v838_v14 = vpop.permute.xlu0 %837 }
 0x1c8   : > { %2557 = vtanh.f32 %v964_v16 }
 0x1c9   : > { %v969_v21 = vpop.f32.mrb[6].mxu0  ;;  %2559 = vtanh.f32 %v966_v19 }
 0x1ca   : > { %v970_v22 = vadd.f32 %v969_v21, %v823_v20  ;;  %v971_v8 = vpop.f32.mrb[7].mxu0  ;;  %v2550_v11 = vpop.eup %2549 }
 0x1cb   : > { %v972_v23 = vadd.f32 %v971_v8, %v823_v20  ;;  %v2552_v28 = vpop.eup %2551 }
 0x1cc   : > { %2561 = vtanh.f32 %v970_v22 }
 0x1cd   : > { %2563 = vtanh.f32 %v972_v23  ;;  %v975_v36 = vpop.f32.mrb[8].mxu0  ;;  %v843_v23 = vpop.permute.xlu1 %842 }
 0x1ce   : > { %v2554_v38 = vpop.eup %2553  ;;  %v976_v39 = vadd.f32 %v975_v36, %v828_v31  ;;  %v977_v41 = vpop.f32.mrb[9].mxu0 }
 0x1cf   : > { %v2556_v44 = vpop.eup %2555  ;;  %v978_v48 = vadd.f32 %v977_v41, %v828_v31  ;;  %v2347_v51 = vpack.c.bf16 %v2554_v38, %v2550_v11  ;;  %v848_v41 = vpop.permute.xlu0 %847 }
 0x1d0   : > { %v2345_v52 = vpack.c.bf16 %v2556_v44, %v2552_v28  ;;  %2565 = vtanh.f32 %v976_v39 }
 0x1d1   : > { %v981_v55 = vpop.f32.mrb[10].mxu0  ;;  %2567 = vtanh.f32 %v978_v48 }
 0x1d2   : > { %v982_v62 = vadd.f32 %v981_v55, %v833_v53  ;;  %v983_v2 = vpop.f32.mrb[11].mxu0  ;;  %2346 = vmatprep.subr.bf16.mxu1 %v2345_v52  ;;  %v2558_v5 = vpop.eup %2557 }
 0x1d3   : > { %v984_v4 = vadd.f32 %v983_v2, %v833_v53  ;;  %2348 = vmatpush1.bf16.msra.mxu1 %v2347_v51  ;;  %v2560_v7 = vpop.eup %2559 }
 0x1d4   : > { %2569 = vtanh.f32 %v982_v62 }
 0x1d5   : > { %2571 = vtanh.f32 %v984_v4  ;;  %v987_v15 = vpop.f32.mrb[12].mxu0  ;;  %v853_v4 = vpop.permute.xlu1 %852 }
 0x1d6   : > { %v2562_v16 = vpop.eup %2561  ;;  %v988_v17 = vadd.f32 %v987_v15, %v838_v14  ;;  %v989_v19 = vpop.f32.mrb[13].mxu0 }
 0x1d7   : > { %v2564_v20 = vpop.eup %2563  ;;  %v990_v21 = vadd.f32 %v989_v19, %v838_v14  ;;  %v2351_v22 = vpack.c.bf16 %v2562_v16, %v2558_v5  ;;  %v858_v19 = vpop.permute.xlu0 %857 }
 0x1d8   : > { %v2349_v8 = vpack.c.bf16 %v2564_v20, %v2560_v7  ;;  %2573 = vtanh.f32 %v988_v17 }
 0x1d9   : > { %v993_v11 = vpop.f32.mrb[14].mxu0  ;;  %2575 = vtanh.f32 %v990_v21 }
 0x1da   : > { %v994_v28 = vadd.f32 %v993_v11, %v843_v23  ;;  %v995_v31 = vpop.f32.mrb[15].mxu0  ;;  %2350 = vmatprep.subr.bf16.mxu1 %v2349_v8  ;;  %v2566_v38 = vpop.eup %2565 }
 0x1db   : > { %v996_v36 = vadd.f32 %v995_v31, %v843_v23  ;;  %2352 = vmatpush1.bf16.msra.mxu1 %v2351_v22  ;;  %v2568_v39 = vpop.eup %2567 }
 0x1dc   : > { %2577 = vtanh.f32 %v994_v28 }
 0x1dd   : > { %2579 = vtanh.f32 %v996_v36  ;;  %v999_v44 = vpop.f32.mrb[16].mxu0  ;;  %v863_v36 = vpop.permute.xlu1 %862 }
 0x1de   : > { %v2570_v48 = vpop.eup %2569  ;;  %v1000_v51 = vadd.f32 %v999_v44, %v848_v41  ;;  %v1001_v52 = vpop.f32.mrb[17].mxu0 }
 0x1df   : > { %v2572_v53 = vpop.eup %2571  ;;  %v1002_v55 = vadd.f32 %v1001_v52, %v848_v41  ;;  %v2355_v62 = vpack.c.bf16 %v2570_v48, %v2566_v38  ;;  %v868_v52 = vpop.permute.xlu0 %867 }
 0x1e0   : > { %v2353_v2 = vpack.c.bf16 %v2572_v53, %v2568_v39  ;;  %2581 = vtanh.f32 %v1000_v51 }
 0x1e1   : > { %v1005_v5 = vpop.f32.mrb[18].mxu0  ;;  %2583 = vtanh.f32 %v1002_v55 }
 0x1e2   : > { %v1006_v7 = vadd.f32 %v1005_v5, %v853_v4  ;;  %v1007_v14 = vpop.f32.mrb[19].mxu0  ;;  %2354 = vmatprep.subr.bf16.mxu1 %v2353_v2  ;;  %v2574_v16 = vpop.eup %2573 }
 0x1e3   : > { %v1008_v15 = vadd.f32 %v1007_v14, %v853_v4  ;;  %2356 = vmatpush1.bf16.msra.mxu1 %v2355_v62  ;;  %v2576_v17 = vpop.eup %2575 }
 0x1e4   : > { %2585 = vtanh.f32 %v1006_v7 }
 0x1e5   : > { %2587 = vtanh.f32 %v1008_v15  ;;  %v1011_v20 = vpop.f32.mrb[20].mxu0  ;;  %v873_v15 = vpop.permute.xlu1 %872 }
 0x1e6   : > { %v2578_v21 = vpop.eup %2577  ;;  %v1012_v22 = vadd.f32 %v1011_v20, %v858_v19  ;;  %v1013_v8 = vpop.f32.mrb[21].mxu0 }
 0x1e7   : > { %v2580_v23 = vpop.eup %2579  ;;  %v1014_v11 = vadd.f32 %v1013_v8, %v858_v19  ;;  %v2359_v28 = vpack.c.bf16 %v2578_v21, %v2574_v16  ;;  %v878_v8 = vpop.permute.xlu0 %877 }
 0x1e8   : > { %v2357_v31 = vpack.c.bf16 %v2580_v23, %v2576_v17  ;;  %2589 = vtanh.f32 %v1012_v22 }
 0x1e9   : > { %v1017_v38 = vpop.f32.mrb[22].mxu0  ;;  %2591 = vtanh.f32 %v1014_v11 }
 0x1ea   : > { %v1018_v39 = vadd.f32 %v1017_v38, %v863_v36  ;;  %v1019_v41 = vpop.f32.mrb[23].mxu0  ;;  %2358 = vmatprep.subr.bf16.mxu1 %v2357_v31  ;;  %v2582_v48 = vpop.eup %2581 }
 0x1eb   : > { %v1020_v44 = vadd.f32 %v1019_v41, %v863_v36  ;;  %2360 = vmatpush1.bf16.msra.mxu1 %v2359_v28  ;;  %v2584_v51 = vpop.eup %2583 }
 0x1ec   : > { %2593 = vtanh.f32 %v1018_v39 }
 0x1ed   : > { %2595 = vtanh.f32 %v1020_v44  ;;  %v1023_v53 = vpop.f32.mrb[24].mxu0  ;;  %v883_v44 = vpop.permute.xlu1 %882 }
 0x1ee   : > { %v2586_v55 = vpop.eup %2585  ;;  %v1024_v62 = vadd.f32 %v1023_v53, %v868_v52  ;;  %v1025_v2 = vpop.f32.mrb[25].mxu0 }
 0x1ef   : > { %v2588_v4 = vpop.eup %2587  ;;  %v1026_v5 = vadd.f32 %v1025_v2, %v868_v52  ;;  %v2363_v7 = vpack.c.bf16 %v2586_v55, %v2582_v48 }
 0x1f0   : > { %v2361_v14 = vpack.c.bf16 %v2588_v4, %v2584_v51  ;;  %2597 = vtanh.f32 %v1024_v62 }
 0x1f1   : > { %v1029_v16 = vpop.f32.mrb[26].mxu0  ;;  %2599 = vtanh.f32 %v1026_v5 }
 0x1f2   : > { %v1030_v17 = vadd.f32 %v1029_v16, %v873_v15  ;;  %v1031_v19 = vpop.f32.mrb[27].mxu0  ;;  %2362 = vmatprep.subr.bf16.mxu1 %v2361_v14  ;;  %v2590_v21 = vpop.eup %2589 }
 0x1f3   : > { %v1032_v20 = vadd.f32 %v1031_v19, %v873_v15  ;;  %2364 = vmatpush1.bf16.msra.mxu1 %v2363_v7  ;;  %v2592_v22 = vpop.eup %2591 }
 0x1f4   : > { %2601 = vtanh.f32 %v1030_v17 }
 0x1f5   : > { %2603 = vtanh.f32 %v1032_v20  ;;  %v1035_v23 = vpop.f32.mrb[28].mxu0 }
 0x1f6   : > { %v2594_v11 = vpop.eup %2593  ;;  %v1036_v28 = vadd.f32 %v1035_v23, %v878_v8  ;;  %v1037_v31 = vpop.f32.mrb[29].mxu0  ;;  %v776_v23 = vld [vmem:[%s3989_s5 + $0x18] sm:$0xff] }
 0x1f7   : > { %v2596_v36 = vpop.eup %2595  ;;  %v1038_v38 = vadd.f32 %v1037_v31, %v878_v8  ;;  %v2367_v39 = vpack.c.bf16 %v2594_v11, %v2590_v21  ;;  %v773_v21 = vld [vmem:[%s3989_s5] sm:$0xff]  ;;  %v775_v8 = vld [vmem:[%s3989_s5 + $0x10] sm:$0xff] }
 0x1f8   : > { %v2365_v41 = vpack.c.bf16 %v2596_v36, %v2592_v22  ;;  %2605 = vtanh.f32 %v1036_v28  ;;  %v774_v22 = vld [vmem:[%s3989_s5 + $0x8] sm:$0xff]  ;;  %v777_v11 = vld [vmem:[%s3989_s5 + $0x20] sm:$0xff]  ;;  %v779_v31 = vld [vmem:[%s3989_s5 + $0x30] sm:$0xff] }
 0x1f9   : > { %v1041_v48 = vpop.f32.mrb[30].mxu0  ;;  %2607 = vtanh.f32 %v1038_v38  ;;  %v778_v28 = vld [vmem:[%s3989_s5 + $0x28] sm:$0xff]  ;;  %v780_v36 = vld [vmem:[%s3989_s5 + $0x38] sm:$0xff]  ;;  %v781_v38 = vld [vmem:[%s3989_s5 + $0x40] sm:$0xff] }
 0x1fa   : > { %v1042_v51 = vadd.f32 %v1041_v48, %v883_v44  ;;  %v1043_v52 = vpop.f32.mrb[31].mxu0  ;;  %2366 = vmatprep.subr.bf16.mxu1 %v2365_v41  ;;  %v2598_v55 = vpop.eup %2597  ;;  %v783_v41 = vld [vmem:[%s3989_s5 + $0x50] sm:$0xff]  ;;  %v785_v48 = vld [vmem:[%s3989_s5 + $0x60] sm:$0xff] }
 0x1fb   : > { %v1044_v53 = vadd.f32 %v1043_v52, %v883_v44  ;;  %2368 = vmatpush1.bf16.msra.mxu1 %v2367_v39  ;;  %v2600_v62 = vpop.eup %2599  ;;  %v782_v39 = vld [vmem:[%s3989_s5 + $0x48] sm:$0xff]  ;;  %v784_v44 = vld [vmem:[%s3989_s5 + $0x58] sm:$0xff]  ;;  %v787_v52 = vld [vmem:[%s3989_s5 + $0x70] sm:$0xff] }
 0x1fc   : > { %2609 = vtanh.f32 %v1042_v51  ;;  %v786_v51 = vld [vmem:[%s3989_s5 + $0x68] sm:$0xff] }
 0x1fd   : > { %2611 = vtanh.f32 %v1044_v53  ;;  %v788_v53 = vld [vmem:[%s3989_s5 + $0x78] sm:$0xff] }
 0x1fe   : > { %v2602_v2 = vpop.eup %2601 }
 0x1ff   : > { %v2604_v4 = vpop.eup %2603  ;;  %v2371_v5 = vpack.c.bf16 %v2602_v2, %v2598_v55 }
 0x200   : > { %v2369_v7 = vpack.c.bf16 %v2604_v4, %v2600_v62  ;;  %v1081_v62 = vpop.permute.xlu0 %1080 }
 0x202   : > { %2370 = vmatprep.subr.bf16.mxu1 %v2369_v7  ;;  %v2606_v14 = vpop.eup %2605  ;;  %v1086_v7 = vpop.permute.xlu1 %1085 }
 0x203   : > { %2372 = vmatpush1.bf16.msra.mxu1 %v2371_v5  ;;  %v2608_v15 = vpop.eup %2607 }
 0x206   : > { %v2610_v16 = vpop.eup %2609 }
 0x207   : > { %v2612_v17 = vpop.eup %2611  ;;  %v2375_v19 = vpack.c.bf16 %v2610_v16, %v2606_v14 }
 0x208   : > { %v2373_v20 = vpack.c.bf16 %v2612_v17, %v2608_v15 }
 0x20a   : > { %2374 = vmatprep.subr.bf16.mxu1 %v2373_v20 }
 0x20b   : > { %2376 = vmatpush1.bf16.msra.mxu1 %v2375_v19 }
 0x20e   : > { %1223 = vmatmul.mubr.f32.vlgmr.msra.gmra.mrb[0].mxu1 %v773_v21 }
 0x20f   : > { %1228 = vmatprep.mubr.f32.mxu1 %v2870_v46 }
 0x212   : > { %1229 = vmatmul.mubr.f32.gmra.mrb[2].mxu1 %v774_v22 }
 0x213   : > { %1234 = vmatprep.mubr.f32.mxu1 %v2870_v46 }
 0x216   : > { %1235 = vmatmul.mubr.f32.gmra.mrb[4].mxu1 %v775_v8 }
 0x217   : > { %1240 = vmatprep.mubr.f32.mxu1 %v2870_v46 }
 0x21a   : > { %1241 = vmatmul.mubr.f32.gmra.mrb[6].mxu1 %v776_v23  ;;  %v1091_v23 = vpop.permute.xlu0 %1090 }
 0x21b   : > { %1246 = vmatprep.mubr.f32.mxu1 %v2870_v46 }
 0x21e   : > { %1247 = vmatmul.mubr.f32.gmra.mrb[8].mxu1 %v777_v11 }
 0x21f   : > { %1252 = vmatprep.mubr.f32.mxu1 %v2870_v46 }
 0x222   : > { %1253 = vmatmul.mubr.f32.gmra.mrb[10].mxu1 %v778_v28 }
 0x223   : > { %1258 = vmatprep.mubr.f32.mxu1 %v2870_v46 }
 0x226   : > { %1259 = vmatmul.mubr.f32.gmra.mrb[12].mxu1 %v779_v31 }
 0x227   : > { %1264 = vmatprep.mubr.f32.mxu1 %v2870_v46 }
 0x22a   : > { %1265 = vmatmul.mubr.f32.gmra.mrb[14].mxu1 %v780_v36 }
 0x22b   : > { %1270 = vmatprep.mubr.f32.mxu1 %v2870_v46 }
 0x22e   : > { %1271 = vmatmul.mubr.f32.gmra.mrb[16].mxu1 %v781_v38 }
 0x22f   : > { %1276 = vmatprep.mubr.f32.mxu1 %v2870_v46 }
 0x232   : > { %1277 = vmatmul.mubr.f32.gmra.mrb[18].mxu1 %v782_v39 }
 0x233   : > { %1282 = vmatprep.mubr.f32.mxu1 %v2870_v46 }
 0x236   : > { %1283 = vmatmul.mubr.f32.gmra.mrb[20].mxu1 %v783_v41 }
 0x237   : > { %1288 = vmatprep.mubr.f32.mxu1 %v2870_v46 }
 0x23a   : > { %1289 = vmatmul.mubr.f32.gmra.mrb[22].mxu1 %v784_v44 }
 0x23b   : > { %1294 = vmatprep.mubr.f32.mxu1 %v2870_v46 }
 0x23e   : > { %1295 = vmatmul.mubr.f32.gmra.mrb[24].mxu1 %v785_v48 }
 0x23f   : > { %1300 = vmatprep.mubr.f32.mxu1 %v2870_v46 }
 0x242   : > { %1301 = vmatmul.mubr.f32.gmra.mrb[26].mxu1 %v786_v51  ;;  %v1101_v51 = vpop.permute.xlu0 %1100 }
 0x243   : > { %1306 = vmatprep.mubr.f32.mxu1 %v2870_v46 }
 0x246   : > { %1307 = vmatmul.mubr.f32.gmra.mrb[28].mxu1 %v787_v52 }
 0x247   : > { %1312 = vmatprep.mubr.f32.mxu1 %v2870_v46 }
 0x24a   : > { %1313 = vmatmul.mubr.f32.gmra.mrb[30].mxu1 %v788_v53 }
 0x24b   : > { %1864 = vmatprep.mubr.f32.mxu1 %v2870_v46 }
 0x2e1   : > { %v1224_v55 = vpop.f32.mrb[0].mxu1 }
 0x2e2   : > { %v1226_v2 = vpop.f32.mrb[1].mxu1  ;;  %v1225_v5 = vadd.f32 %v1224_v55, %v1081_v62 }
 0x2e3   : > { %v1227_v4 = vadd.f32 %v1226_v2, %v1081_v62 }
 0x2e4   : > { %v1319_v20 = vadd.f32 %v3241_v47, %v1225_v5 }
 0x2e5   : > { %v1320_v14 = vadd.f32 %v3257_v58, %v1227_v4  ;;  %v1230_v15 = vpop.f32.mrb[2].mxu1  ;;  %v1096_v58 = vpop.permute.xlu1 %1095 }
 0x2e6   : > { %v1231_v16 = vadd.f32 %v1230_v15, %v1086_v7  ;;  %v1232_v17 = vpop.f32.mrb[3].mxu1 }
 0x2e7   : > { %v1233_v19 = vadd.f32 %v1232_v17, %v1086_v7  ;;  %2613 = vtanh.f32 %v1320_v14 }
 0x2e8   : > { %v1321_v21 = vadd.f32 %v3246_v49, %v1231_v16 }
 0x2e9   : > { %v1322_v22 = vadd.f32 %v3254_v54, %v1233_v19  ;;  %v1236_v8 = vpop.f32.mrb[4].mxu1 }
 0x2ea   : > { %2615 = vtanh.f32 %v1321_v21  ;;  %v1238_v11 = vpop.f32.mrb[5].mxu1  ;;  %v1237_v31 = vadd.f32 %v1236_v8, %v1091_v23  ;;  %v1111_v21 = vpop.permute.xlu0 %1110 }
 0x2eb   : > { %2617 = vtanh.f32 %v1322_v22  ;;  %v1239_v28 = vadd.f32 %v1238_v11, %v1091_v23 }
 0x2ec   : > { %2619 = vtanh.f32 %v1319_v20  ;;  %v1323_v49 = vadd.f32 %v3276_v13, %v1237_v31  ;;  %v1106_v13 = vpop.permute.xlu1 %1105 }
 0x2ed   : > { %v1324_v36 = vadd.f32 %v3284_v18, %v1239_v28  ;;  %v1242_v38 = vpop.f32.mrb[6].mxu1 }
 0x2ee   : > { %v1243_v39 = vadd.f32 %v1242_v38, %v1096_v58  ;;  %v1244_v41 = vpop.f32.mrb[7].mxu1 }
 0x2ef   : > { %v1245_v47 = vadd.f32 %v1244_v41, %v1096_v58  ;;  %2621 = vtanh.f32 %v1324_v36 }
 0x2f0   : > { %v1325_v44 = vadd.f32 %v3269_v9, %v1243_v39 }
 0x2f1   : > { %v1326_v54 = vadd.f32 %v3271_v10, %v1245_v47  ;;  %v1248_v48 = vpop.f32.mrb[8].mxu1  ;;  %v3611_v53 = vpop.eup %2613 }
 0x2f2   : > { %2623 = vtanh.f32 %v1325_v44  ;;  %v1250_v52 = vpop.f32.mrb[9].mxu1  ;;  %v1249_v62 = vadd.f32 %v1248_v48, %v1101_v51  ;;  %v1121_v48 = vpop.permute.xlu0 %1120 }
 0x2f3   : > { %2625 = vtanh.f32 %v1326_v54  ;;  %v1251_v55 = vadd.f32 %v1250_v52, %v1101_v51 }
 0x2f4   : > { %v3613_v18 = vpop.eup %2615  ;;  %2627 = vtanh.f32 %v1323_v49  ;;  %v1327_v17 = vadd.f32 %v3304_v35, %v1249_v62 }
 0x2f5   : > { %v3615_v2 = vpop.eup %2617  ;;  %v1328_v9 = vadd.f32 %v3312_v40, %v1251_v55  ;;  %v1254_v4 = vpop.f32.mrb[10].mxu1 }
 0x2f6   : > { %v3618_v5 = vpop.eup %2619  ;;  %v1255_v10 = vadd.f32 %v1254_v4, %v1106_v13  ;;  %v1256_v7 = vpop.f32.mrb[11].mxu1  ;;  %v2377_v14 = vpack.c.bf16 %v3615_v2, %v3611_v53 }
 0x2f7   : > { %v1257_v15 = vadd.f32 %v1256_v7, %v1106_v13  ;;  %v2379_v16 = vpack.c.bf16 %v3613_v18, %v3618_v5  ;;  %2629 = vtanh.f32 %v1328_v9 }
 0x2f8   : > { %v1329_v19 = vadd.f32 %v3297_v32, %v1255_v10  ;;  %2378 = vmatprep.subr.bf16.mxu0 %v2377_v14  ;;  %v1116_v32 = vpop.permute.xlu1 %1115 }
 0x2f9   : > { %v1330_v40 = vadd.f32 %v3299_v33, %v1257_v15  ;;  %v1260_v20 = vpop.f32.mrb[12].mxu1  ;;  %2380 = vmatpush1.bf16.msra.mxu0 %v2379_v16  ;;  %v3627_v8 = vpop.eup %2621 }
 0x2fa   : > { %2631 = vtanh.f32 %v1329_v19  ;;  %v1262_v22 = vpop.f32.mrb[13].mxu1  ;;  %v1261_v28 = vadd.f32 %v1260_v20, %v1111_v21  ;;  %v1131_v20 = vpop.permute.xlu0 %1130 }
 0x2fb   : > { %2633 = vtanh.f32 %v1330_v40  ;;  %v1263_v23 = vadd.f32 %v1262_v22, %v1111_v21 }
 0x2fc   : > { %v3629_v11 = vpop.eup %2623  ;;  %2635 = vtanh.f32 %v1327_v17  ;;  %v1331_v49 = vadd.f32 %v3332_v63, %v1261_v28 }
 0x2fd   : > { %v3631_v35 = vpop.eup %2625  ;;  %v1332_v31 = vadd.f32 %v3340_v6, %v1263_v23  ;;  %v1266_v58 = vpop.f32.mrb[14].mxu1 }
 0x2fe   : > { %v3634_v33 = vpop.eup %2627  ;;  %v1267_v36 = vadd.f32 %v1266_v58, %v1116_v32  ;;  %v1268_v38 = vpop.f32.mrb[15].mxu1  ;;  %v2381_v39 = vpack.c.bf16 %v3631_v35, %v3627_v8 }
 0x2ff   : > { %v1269_v41 = vadd.f32 %v1268_v38, %v1116_v32  ;;  %v2383_v47 = vpack.c.bf16 %v3629_v11, %v3634_v33  ;;  %2637 = vtanh.f32 %v1332_v31 }
 0x300   : > { %v1333_v44 = vadd.f32 %v3325_v59, %v1267_v36  ;;  %2382 = vmatprep.subr.bf16.mxu0 %v2381_v39  ;;  %v1126_v59 = vpop.permute.xlu1 %1125 }
 0x301   : > { %v1334_v6 = vadd.f32 %v3327_v60, %v1269_v41  ;;  %v1272_v54 = vpop.f32.mrb[16].mxu1  ;;  %2384 = vmatpush1.bf16.msra.mxu0 %v2383_v47  ;;  %v3643_v52 = vpop.eup %2629 }
 0x302   : > { %2639 = vtanh.f32 %v1333_v44  ;;  %v1274_v51 = vpop.f32.mrb[17].mxu1  ;;  %v1273_v13 = vadd.f32 %v1272_v54, %v1121_v48  ;;  %v1141_v54 = vpop.permute.xlu0 %1140 }
 0x303   : > { %2641 = vtanh.f32 %v1334_v6  ;;  %v1275_v55 = vadd.f32 %v1274_v51, %v1121_v48 }
 0x304   : > { %v3645_v62 = vpop.eup %2631  ;;  %2643 = vtanh.f32 %v1331_v49  ;;  %v1335_v17 = vadd.f32 %v3360_v29, %v1273_v13 }
 0x305   : > { %v3647_v63 = vpop.eup %2633  ;;  %v1336_v9 = vadd.f32 %v3368_v37, %v1275_v55  ;;  %v1278_v4 = vpop.f32.mrb[18].mxu1 }
 0x306   : > { %v3650_v60 = vpop.eup %2635  ;;  %v1279_v10 = vadd.f32 %v1278_v4, %v1126_v59  ;;  %v1280_v7 = vpop.f32.mrb[19].mxu1  ;;  %v2385_v14 = vpack.c.bf16 %v3647_v63, %v3643_v52 }
 0x307   : > { %v1281_v15 = vadd.f32 %v1280_v7, %v1126_v59  ;;  %v2387_v16 = vpack.c.bf16 %v3645_v62, %v3650_v60  ;;  %2645 = vtanh.f32 %v1336_v9 }
 0x308   : > { %v1337_v19 = vadd.f32 %v3353_v26, %v1279_v10  ;;  %2386 = vmatprep.subr.bf16.mxu0 %v2385_v14  ;;  %v1136_v26 = vpop.permute.xlu1 %1135 }
 0x309   : > { %v1338_v37 = vadd.f32 %v3355_v27, %v1281_v15  ;;  %v1284_v40 = vpop.f32.mrb[20].mxu1  ;;  %2388 = vmatpush1.bf16.msra.mxu0 %v2387_v16  ;;  %v3659_v22 = vpop.eup %2637 }
 0x30a   : > { %2647 = vtanh.f32 %v1337_v19  ;;  %v1286_v21 = vpop.f32.mrb[21].mxu1  ;;  %v1285_v32 = vadd.f32 %v1284_v40, %v1131_v20  ;;  %v1151_v40 = vpop.permute.xlu0 %1150 }
 0x30b   : > { %2649 = vtanh.f32 %v1338_v37  ;;  %v1287_v23 = vadd.f32 %v1286_v21, %v1131_v20 }
 0x30c   : > { %v3661_v28 = vpop.eup %2639  ;;  %2651 = vtanh.f32 %v1335_v17  ;;  %v1339_v49 = vadd.f32 %v3388_v1, %v1285_v32 }
 0x30d   : > { %v3663_v29 = vpop.eup %2641  ;;  %v1340_v31 = vadd.f32 %v3396_v12, %v1287_v23  ;;  %v1290_v58 = vpop.f32.mrb[22].mxu1 }
 0x30e   : > { %v3666_v27 = vpop.eup %2643  ;;  %v1291_v36 = vadd.f32 %v1290_v58, %v1136_v26  ;;  %v1292_v38 = vpop.f32.mrb[23].mxu1  ;;  %v2389_v39 = vpack.c.bf16 %v3663_v29, %v3659_v22 }
 0x30f   : > { %v1293_v41 = vadd.f32 %v1292_v38, %v1136_v26  ;;  %v2391_v47 = vpack.c.bf16 %v3661_v28, %v3666_v27  ;;  %2653 = vtanh.f32 %v1340_v31 }
 0x310   : > { %v1341_v44 = vadd.f32 %v3381_v56, %v1291_v36  ;;  %2390 = vmatprep.subr.bf16.mxu0 %v2389_v39  ;;  %v1146_v56 = vpop.permute.xlu1 %1145 }
 0x311   : > { %v1342_v12 = vadd.f32 %v3383_v57, %v1293_v41  ;;  %v1296_v6 = vpop.f32.mrb[24].mxu1  ;;  %2392 = vmatpush1.bf16.msra.mxu0 %v2391_v47  ;;  %v3675_v51 = vpop.eup %2645 }
 0x312   : > { %2655 = vtanh.f32 %v1341_v44  ;;  %v1298_v48 = vpop.f32.mrb[25].mxu1  ;;  %v1297_v59 = vadd.f32 %v1296_v6, %v1141_v54 }
 0x313   : > { %2657 = vtanh.f32 %v1342_v12  ;;  %v1299_v55 = vadd.f32 %v1298_v48, %v1141_v54 }
 0x314   : > { %v3677_v13 = vpop.eup %2647  ;;  %2659 = vtanh.f32 %v1339_v49  ;;  %v1343_v17 = vadd.f32 %v3416_v30, %v1297_v59 }
 0x315   : > { %v3679_v1 = vpop.eup %2649  ;;  %v1344_v9 = vadd.f32 %v3421_v34, %v1299_v55  ;;  %v1302_v4 = vpop.f32.mrb[26].mxu1 }
 0x316   : > { %v3682_v57 = vpop.eup %2651  ;;  %v1303_v10 = vadd.f32 %v1302_v4, %v1146_v56  ;;  %v1304_v7 = vpop.f32.mrb[27].mxu1  ;;  %v2393_v14 = vpack.c.bf16 %v3679_v1, %v3675_v51 }
 0x317   : > { %v1305_v15 = vadd.f32 %v1304_v7, %v1146_v56  ;;  %v2395_v16 = vpack.c.bf16 %v3677_v13, %v3682_v57  ;;  %2661 = vtanh.f32 %v1344_v9  ;;  %v1384_v7 = vld [vmem:[%s3991_s7 + $0x8] sm:$0xff] }
 0x318   : > { %v1345_v19 = vadd.f32 %v3409_v24, %v1303_v10  ;;  %2394 = vmatprep.subr.bf16.mxu0 %v2393_v14  ;;  %v1156_v24 = vpop.permute.xlu1 %1155  ;;  %v1383_v10 = vld [vmem:[%s3991_s7] sm:$0xff]  ;;  %v1385_v14 = vld [vmem:[%s3991_s7 + $0x10] sm:$0xff] }
 0x319   : > { %v1346_v34 = vadd.f32 %v3411_v25, %v1305_v15  ;;  %v1308_v37 = vpop.f32.mrb[28].mxu1  ;;  %2396 = vmatpush1.bf16.msra.mxu0 %v2395_v16  ;;  %v3691_v21 = vpop.eup %2653  ;;  %v1386_v15 = vld [vmem:[%s3991_s7 + $0x18] sm:$0xff]  ;;  %v1387_v16 = vld [vmem:[%s3991_s7 + $0x20] sm:$0xff] }
 0x31a   : > { %2663 = vtanh.f32 %v1345_v19  ;;  %v1310_v20 = vpop.f32.mrb[29].mxu1  ;;  %v1309_v26 = vadd.f32 %v1308_v37, %v1151_v40  ;;  %v1389_v19 = vld [vmem:[%s3991_s7 + $0x30] sm:$0xff]  ;;  %v1391_v37 = vld [vmem:[%s3991_s7 + $0x40] sm:$0xff] }
 0x31b   : > { %2665 = vtanh.f32 %v1346_v34  ;;  %v1311_v23 = vadd.f32 %v1310_v20, %v1151_v40  ;;  %v1390_v34 = vld [vmem:[%s3991_s7 + $0x38] sm:$0xff]  ;;  %v1392_v40 = vld [vmem:[%s3991_s7 + $0x48] sm:$0xff]  ;;  %v1393_v20 = vld [vmem:[%s3991_s7 + $0x50] sm:$0xff] }
 0x31c   : > { %v3693_v32 = vpop.eup %2655  ;;  %2667 = vtanh.f32 %v1343_v17  ;;  %v1347_v49 = vadd.f32 %v3440_v45, %v1309_v26  ;;  %v1388_v17 = vld [vmem:[%s3991_s7 + $0x28] sm:$0xff]  ;;  %v1395_v26 = vld [vmem:[%s3991_s7 + $0x60] sm:$0xff] }
 0x31d   : > { %v3695_v30 = vpop.eup %2657  ;;  %v1348_v31 = vadd.f32 %v3445_v50, %v1311_v23  ;;  %v1314_v58 = vpop.f32.mrb[30].mxu1  ;;  %v1394_v23 = vld [vmem:[%s3991_s7 + $0x58] sm:$0xff] }
 0x31e   : > { %v3698_v25 = vpop.eup %2659  ;;  %v1315_v36 = vadd.f32 %v1314_v58, %v1156_v24  ;;  %v1316_v38 = vpop.f32.mrb[31].mxu1  ;;  %v2397_v39 = vpack.c.bf16 %v3695_v30, %v3691_v21  ;;  %v1398_v58 = vld [vmem:[%s3991_s7 + $0x78] sm:$0xff] }
 0x31f   : > { %v1317_v41 = vadd.f32 %v1316_v38, %v1156_v24  ;;  %v2399_v47 = vpack.c.bf16 %v3693_v32, %v3698_v25  ;;  %2669 = vtanh.f32 %v1348_v31  ;;  %v1396_v24 = vld [vmem:[%s3991_s7 + $0x68] sm:$0xff]  ;;  %v1397_v31 = vld [vmem:[%s3991_s7 + $0x70] sm:$0xff] }
 0x320   : > { %v1349_v44 = vadd.f32 %v3433_v42, %v1315_v36  ;;  %2398 = vmatprep.subr.bf16.mxu0 %v2397_v39  ;;  %v1450_v36 = vpop.permute.xlu0 %1449 }
 0x321   : > { %v1350_v50 = vadd.f32 %v3435_v43, %v1317_v41  ;;  %2400 = vmatpush1.bf16.msra.mxu0 %v2399_v47  ;;  %v3707_v12 = vpop.eup %2661 }
 0x322   : > { %2671 = vtanh.f32 %v1349_v44 }
 0x323   : > { %2673 = vtanh.f32 %v1350_v50 }
 0x324   : > { %v3709_v6 = vpop.eup %2663  ;;  %2675 = vtanh.f32 %v1347_v49  ;;  %v1455_v49 = vpop.permute.xlu1 %1454 }
 0x325   : > { %v3711_v54 = vpop.eup %2665 }
 0x326   : > { %v3713_v48 = vpop.eup %2667  ;;  %v2401_v45 = vpack.c.bf16 %v3711_v54, %v3707_v12 }
 0x327   : > { %v2403_v42 = vpack.c.bf16 %v3709_v6, %v3713_v48 }
 0x328   : > { %2402 = vmatprep.subr.bf16.mxu0 %v2401_v45 }
 0x329   : > { %2404 = vmatpush1.bf16.msra.mxu0 %v2403_v42  ;;  %v3719_v43 = vpop.eup %2669 }
 0x32c   : > { %v3721_v55 = vpop.eup %2671 }
 0x32d   : > { %v3723_v59 = vpop.eup %2673 }
 0x32e   : > { %v3725_v56 = vpop.eup %2675  ;;  %v2405_v9 = vpack.c.bf16 %v3723_v59, %v3719_v43 }
 0x32f   : > { %v2407_v4 = vpack.c.bf16 %v3721_v55, %v3725_v56 }
 0x330   : > { %2406 = vmatprep.subr.bf16.mxu0 %v2405_v9  ;;  %v1460_v9 = vpop.permute.xlu0 %1459 }
 0x331   : > { %2408 = vmatpush1.bf16.msra.mxu0 %v2407_v4 }
 0x334   : > { %1592 = vmatmul.mubr.f32.vlgmr.msra.gmra.mrb[32].mxu0 %v1383_v10 }
 0x335   : > { %1597 = vmatprep.mubr.f32.mxu0 %v2870_v46 }
 0x338   : > { %1598 = vmatmul.mubr.f32.gmra.mrb[34].mxu0 %v1384_v7 }
 0x339   : > { %1603 = vmatprep.mubr.f32.mxu0 %v2870_v46 }
 0x33c   : > { %1604 = vmatmul.mubr.f32.gmra.mrb[36].mxu0 %v1385_v14 }
 0x33d   : > { %1609 = vmatprep.mubr.f32.mxu0 %v2870_v46 }
 0x340   : > { %1610 = vmatmul.mubr.f32.gmra.mrb[38].mxu0 %v1386_v15  ;;  %v1465_v15 = vpop.permute.xlu1 %1464 }
 0x341   : > { %1615 = vmatprep.mubr.f32.mxu0 %v2870_v46 }
 0x344   : > { %1616 = vmatmul.mubr.f32.gmra.mrb[40].mxu0 %v1387_v16 }
 0x345   : > { %1621 = vmatprep.mubr.f32.mxu0 %v2870_v46 }
 0x348   : > { %1622 = vmatmul.mubr.f32.gmra.mrb[42].mxu0 %v1388_v17 }
 0x349   : > { %1627 = vmatprep.mubr.f32.mxu0 %v2870_v46 }
 0x34c   : > { %1628 = vmatmul.mubr.f32.gmra.mrb[44].mxu0 %v1389_v19 }
 0x34d   : > { %1633 = vmatprep.mubr.f32.mxu0 %v2870_v46 }
 0x350   : > { %1634 = vmatmul.mubr.f32.gmra.mrb[46].mxu0 %v1390_v34 }
 0x351   : > { %1639 = vmatprep.mubr.f32.mxu0 %v2870_v46 }
 0x354   : > { %1640 = vmatmul.mubr.f32.gmra.mrb[48].mxu0 %v1391_v37 }
 0x355   : > { %1645 = vmatprep.mubr.f32.mxu0 %v2870_v46 }
 0x358   : > { %1646 = vmatmul.mubr.f32.gmra.mrb[50].mxu0 %v1392_v40 }
 0x359   : > { %1651 = vmatprep.mubr.f32.mxu0 %v2870_v46 }
 0x35c   : > { %1652 = vmatmul.mubr.f32.gmra.mrb[52].mxu0 %v1393_v20  ;;  %v1470_v20 = vpop.permute.xlu0 %1469 }
 0x35d   : > { %1657 = vmatprep.mubr.f32.mxu0 %v2870_v46 }
 0x360   : > { %1658 = vmatmul.mubr.f32.gmra.mrb[54].mxu0 %v1394_v23 }
 0x361   : > { %1663 = vmatprep.mubr.f32.mxu0 %v2870_v46 }
 0x364   : > { %1664 = vmatmul.mubr.f32.gmra.mrb[56].mxu0 %v1395_v26 }
 0x365   : > { %1669 = vmatprep.mubr.f32.mxu0 %v2870_v46 }
 0x368   : > { %1670 = vmatmul.mubr.f32.gmra.mrb[58].mxu0 %v1396_v24 }
 0x369   : > { %1675 = vmatprep.mubr.f32.mxu0 %v2870_v46 }
 0x36c   : > { %1676 = vmatmul.mubr.f32.gmra.mrb[60].mxu0 %v1397_v31 }
 0x36d   : > { %1681 = vmatprep.mubr.f32.mxu0 %v2870_v46 }
 0x370   : > { %1682 = vmatmul.mubr.f32.gmra.mrb[62].mxu0 %v1398_v58 }
 0x407   : > { %v1593_v38 = vpop.f32.mrb[32].mxu0 }
 0x408   : > { %v1594_v39 = vadd.f32 %v1593_v38, %v1450_v36  ;;  %v1595_v41 = vpop.f32.mrb[33].mxu0 }
 0x409   : > { %v1596_v47 = vadd.f32 %v1595_v41, %v1450_v36  ;;  %v1475_v41 = vpop.permute.xlu1 %1474 }
 0x40a   : > { %2677 = vtanh.f32 %v1594_v39 }
 0x40b   : > { %v1599_v44 = vpop.f32.mrb[34].mxu0  ;;  %2679 = vtanh.f32 %v1596_v47 }
 0x40c   : > { %v1600_v50 = vadd.f32 %v1599_v44, %v1455_v49  ;;  %v1601_v45 = vpop.f32.mrb[35].mxu0 }
 0x40d   : > { %v1602_v42 = vadd.f32 %v1601_v45, %v1455_v49 }
 0x40e   : > { %2681 = vtanh.f32 %v1600_v50 }
 0x40f   : > { %2683 = vtanh.f32 %v1602_v42  ;;  %v1605_v4 = vpop.f32.mrb[36].mxu0 }
 0x410   : > { %v1606_v10 = vadd.f32 %v1605_v4, %v1460_v9  ;;  %v1607_v7 = vpop.f32.mrb[37].mxu0 }
 0x411   : > { %v1608_v14 = vadd.f32 %v1607_v7, %v1460_v9  ;;  %v1480_v9 = vpop.permute.xlu0 %1479 }
 0x412   : > { %2685 = vtanh.f32 %v1606_v10 }
 0x413   : > { %v1611_v16 = vpop.f32.mrb[38].mxu0  ;;  %2687 = vtanh.f32 %v1608_v14 }
 0x414   : > { %v1612_v17 = vadd.f32 %v1611_v16, %v1465_v15  ;;  %v1613_v19 = vpop.f32.mrb[39].mxu0  ;;  %v2678_v37 = vpop.eup %2677 }
 0x415   : > { %v1614_v34 = vadd.f32 %v1613_v19, %v1465_v15  ;;  %v2680_v40 = vpop.eup %2679 }
 0x416   : > { %2689 = vtanh.f32 %v1612_v17 }
 0x417   : > { %2691 = vtanh.f32 %v1614_v34  ;;  %v1617_v23 = vpop.f32.mrb[40].mxu0  ;;  %v1485_v34 = vpop.permute.xlu1 %1484 }
 0x418   : > { %v2682_v26 = vpop.eup %2681  ;;  %v1618_v24 = vadd.f32 %v1617_v23, %v1470_v20  ;;  %v1619_v31 = vpop.f32.mrb[41].mxu0 }
 0x419   : > { %v2684_v58 = vpop.eup %2683  ;;  %v1620_v36 = vadd.f32 %v1619_v31, %v1470_v20  ;;  %v2411_v38 = vpack.c.bf16 %v2682_v26, %v2678_v37  ;;  %v1490_v31 = vpop.permute.xlu0 %1489 }
 0x41a   : > { %v2409_v39 = vpack.c.bf16 %v2684_v58, %v2680_v40  ;;  %2693 = vtanh.f32 %v1618_v24 }
 0x41b   : > { %v1623_v47 = vpop.f32.mrb[42].mxu0  ;;  %2695 = vtanh.f32 %v1620_v36 }
 0x41c   : > { %v1624_v49 = vadd.f32 %v1623_v47, %v1475_v41  ;;  %v1625_v44 = vpop.f32.mrb[43].mxu0  ;;  %2410 = vmatprep.subr.bf16.mxu1 %v2409_v39  ;;  %v2686_v45 = vpop.eup %2685 }
 0x41d   : > { %v1626_v50 = vadd.f32 %v1625_v44, %v1475_v41  ;;  %2412 = vmatpush1.bf16.msra.mxu1 %v2411_v38  ;;  %v2688_v42 = vpop.eup %2687 }
 0x41e   : > { %2697 = vtanh.f32 %v1624_v49 }
 0x41f   : > { %2699 = vtanh.f32 %v1626_v50  ;;  %v1629_v4 = vpop.f32.mrb[44].mxu0  ;;  %v1495_v50 = vpop.permute.xlu1 %1494 }
 0x420   : > { %v2690_v10 = vpop.eup %2689  ;;  %v1630_v7 = vadd.f32 %v1629_v4, %v1480_v9  ;;  %v1631_v14 = vpop.f32.mrb[45].mxu0 }
 0x421   : > { %v2692_v15 = vpop.eup %2691  ;;  %v1632_v16 = vadd.f32 %v1631_v14, %v1480_v9  ;;  %v2415_v17 = vpack.c.bf16 %v2690_v10, %v2686_v45  ;;  %v1500_v14 = vpop.permute.xlu0 %1499 }
 0x422   : > { %v2413_v19 = vpack.c.bf16 %v2692_v15, %v2688_v42  ;;  %2701 = vtanh.f32 %v1630_v7 }
 0x423   : > { %v1635_v37 = vpop.f32.mrb[46].mxu0  ;;  %2703 = vtanh.f32 %v1632_v16 }
 0x424   : > { %v1636_v40 = vadd.f32 %v1635_v37, %v1485_v34  ;;  %v1637_v20 = vpop.f32.mrb[47].mxu0  ;;  %2414 = vmatprep.subr.bf16.mxu1 %v2413_v19  ;;  %v2694_v26 = vpop.eup %2693 }
 0x425   : > { %v1638_v23 = vadd.f32 %v1637_v20, %v1485_v34  ;;  %2416 = vmatpush1.bf16.msra.mxu1 %v2415_v17  ;;  %v2696_v24 = vpop.eup %2695 }
 0x426   : > { %2705 = vtanh.f32 %v1636_v40 }
 0x427   : > { %2707 = vtanh.f32 %v1638_v23  ;;  %v1641_v58 = vpop.f32.mrb[48].mxu0  ;;  %v1505_v23 = vpop.permute.xlu1 %1504 }
 0x428   : > { %v2698_v36 = vpop.eup %2697  ;;  %v1642_v38 = vadd.f32 %v1641_v58, %v1490_v31  ;;  %v1643_v39 = vpop.f32.mrb[49].mxu0 }
 0x429   : > { %v2700_v41 = vpop.eup %2699  ;;  %v1644_v47 = vadd.f32 %v1643_v39, %v1490_v31  ;;  %v2419_v49 = vpack.c.bf16 %v2698_v36, %v2694_v26  ;;  %v1510_v39 = vpop.permute.xlu0 %1509 }
 0x42a   : > { %v2417_v44 = vpack.c.bf16 %v2700_v41, %v2696_v24  ;;  %2709 = vtanh.f32 %v1642_v38 }
 0x42b   : > { %v1647_v45 = vpop.f32.mrb[50].mxu0  ;;  %2711 = vtanh.f32 %v1644_v47 }
 0x42c   : > { %v1648_v42 = vadd.f32 %v1647_v45, %v1495_v50  ;;  %v1649_v9 = vpop.f32.mrb[51].mxu0  ;;  %2418 = vmatprep.subr.bf16.mxu1 %v2417_v44  ;;  %v2702_v10 = vpop.eup %2701 }
 0x42d   : > { %v1650_v4 = vadd.f32 %v1649_v9, %v1495_v50  ;;  %2420 = vmatpush1.bf16.msra.mxu1 %v2419_v49  ;;  %v2704_v7 = vpop.eup %2703 }
 0x42e   : > { %2713 = vtanh.f32 %v1648_v42 }
 0x42f   : > { %2715 = vtanh.f32 %v1650_v4  ;;  %v1653_v15 = vpop.f32.mrb[52].mxu0  ;;  %v1515_v4 = vpop.permute.xlu1 %1514 }
 0x430   : > { %v2706_v16 = vpop.eup %2705  ;;  %v1654_v17 = vadd.f32 %v1653_v15, %v1500_v14  ;;  %v1655_v19 = vpop.f32.mrb[53].mxu0 }
 0x431   : > { %v2708_v34 = vpop.eup %2707  ;;  %v1656_v37 = vadd.f32 %v1655_v19, %v1500_v14  ;;  %v2423_v40 = vpack.c.bf16 %v2706_v16, %v2702_v10  ;;  %v1520_v19 = vpop.permute.xlu0 %1519 }
 0x432   : > { %v2421_v20 = vpack.c.bf16 %v2708_v34, %v2704_v7  ;;  %2717 = vtanh.f32 %v1654_v17 }
 0x433   : > { %v1659_v26 = vpop.f32.mrb[54].mxu0  ;;  %2719 = vtanh.f32 %v1656_v37 }
 0x434   : > { %v1660_v24 = vadd.f32 %v1659_v26, %v1505_v23  ;;  %v1661_v31 = vpop.f32.mrb[55].mxu0  ;;  %2422 = vmatprep.subr.bf16.mxu1 %v2421_v20  ;;  %v2710_v36 = vpop.eup %2709 }
 0x435   : > { %v1662_v58 = vadd.f32 %v1661_v31, %v1505_v23  ;;  %2424 = vmatpush1.bf16.msra.mxu1 %v2423_v40  ;;  %v2712_v38 = vpop.eup %2711 }
 0x436   : > { %2721 = vtanh.f32 %v1660_v24 }
 0x437   : > { %2723 = vtanh.f32 %v1662_v58  ;;  %v1665_v41 = vpop.f32.mrb[56].mxu0  ;;  %v1525_v58 = vpop.permute.xlu1 %1524 }
 0x438   : > { %v2714_v47 = vpop.eup %2713  ;;  %v1666_v49 = vadd.f32 %v1665_v41, %v1510_v39  ;;  %v1667_v44 = vpop.f32.mrb[57].mxu0 }
 0x439   : > { %v2716_v50 = vpop.eup %2715  ;;  %v1668_v45 = vadd.f32 %v1667_v44, %v1510_v39  ;;  %v2427_v42 = vpack.c.bf16 %v2714_v47, %v2710_v36 }
 0x43a   : > { %v2425_v9 = vpack.c.bf16 %v2716_v50, %v2712_v38  ;;  %2725 = vtanh.f32 %v1666_v49 }
 0x43b   : > { %v1671_v10 = vpop.f32.mrb[58].mxu0  ;;  %2727 = vtanh.f32 %v1668_v45 }
 0x43c   : > { %v1672_v7 = vadd.f32 %v1671_v10, %v1515_v4  ;;  %v1673_v14 = vpop.f32.mrb[59].mxu0  ;;  %2426 = vmatprep.subr.bf16.mxu1 %v2425_v9  ;;  %v2718_v16 = vpop.eup %2717 }
 0x43d   : > { %v1674_v15 = vadd.f32 %v1673_v14, %v1515_v4  ;;  %2428 = vmatpush1.bf16.msra.mxu1 %v2427_v42  ;;  %v2720_v17 = vpop.eup %2719 }
 0x43e   : > { %2729 = vtanh.f32 %v1672_v7 }
 0x43f   : > { %2731 = vtanh.f32 %v1674_v15  ;;  %v1677_v34 = vpop.f32.mrb[60].mxu0 }
 0x440   : > { %v2722_v37 = vpop.eup %2721  ;;  %v1678_v40 = vadd.f32 %v1677_v34, %v1520_v19  ;;  %v1679_v20 = vpop.f32.mrb[61].mxu0  ;;  %v1418_v34 = vld [vmem:[%s3993_s9 + $0x18] sm:$0xff] }
 0x441   : > { %v2724_v23 = vpop.eup %2723  ;;  %v1680_v26 = vadd.f32 %v1679_v20, %v1520_v19  ;;  %v2431_v24 = vpack.c.bf16 %v2722_v37, %v2718_v16  ;;  %v1415_v16 = vld [vmem:[%s3993_s9] sm:$0xff]  ;;  %v1417_v19 = vld [vmem:[%s3993_s9 + $0x10] sm:$0xff] }
 0x442   : > { %v2429_v31 = vpack.c.bf16 %v2724_v23, %v2720_v17  ;;  %2733 = vtanh.f32 %v1678_v40  ;;  %v1416_v17 = vld [vmem:[%s3993_s9 + $0x8] sm:$0xff]  ;;  %v1419_v37 = vld [vmem:[%s3993_s9 + $0x20] sm:$0xff]  ;;  %v1421_v20 = vld [vmem:[%s3993_s9 + $0x30] sm:$0xff] }
 0x443   : > { %v1683_v36 = vpop.f32.mrb[62].mxu0  ;;  %2735 = vtanh.f32 %v1680_v26  ;;  %v1420_v40 = vld [vmem:[%s3993_s9 + $0x28] sm:$0xff]  ;;  %v1422_v23 = vld [vmem:[%s3993_s9 + $0x38] sm:$0xff]  ;;  %v1423_v26 = vld [vmem:[%s3993_s9 + $0x40] sm:$0xff] }
 0x444   : > { %v1684_v38 = vadd.f32 %v1683_v36, %v1525_v58  ;;  %v1685_v39 = vpop.f32.mrb[63].mxu0  ;;  %2430 = vmatprep.subr.bf16.mxu1 %v2429_v31  ;;  %v2726_v47 = vpop.eup %2725  ;;  %v1425_v31 = vld [vmem:[%s3993_s9 + $0x50] sm:$0xff]  ;;  %v1427_v36 = vld [vmem:[%s3993_s9 + $0x60] sm:$0xff] }
 0x445   : > { %v1686_v41 = vadd.f32 %v1685_v39, %v1525_v58  ;;  %2432 = vmatpush1.bf16.msra.mxu1 %v2431_v24  ;;  %v2728_v49 = vpop.eup %2727  ;;  %v1424_v24 = vld [vmem:[%s3993_s9 + $0x48] sm:$0xff]  ;;  %v1426_v58 = vld [vmem:[%s3993_s9 + $0x58] sm:$0xff]  ;;  %v1429_v39 = vld [vmem:[%s3993_s9 + $0x70] sm:$0xff] }
 0x446   : > { %2737 = vtanh.f32 %v1684_v38  ;;  %v1428_v38 = vld [vmem:[%s3993_s9 + $0x68] sm:$0xff] }
 0x447   : > { %2739 = vtanh.f32 %v1686_v41  ;;  %v1430_v41 = vld [vmem:[%s3993_s9 + $0x78] sm:$0xff] }
 0x448   : > { %v2730_v44 = vpop.eup %2729 }
 0x449   : > { %v2732_v50 = vpop.eup %2731  ;;  %v2435_v45 = vpack.c.bf16 %v2730_v44, %v2726_v47  ;;  %v1723_v47 = vpop.permute.xlu0 %1722 }
 0x44a   : > { %v2433_v42 = vpack.c.bf16 %v2732_v50, %v2728_v49  ;;  %v1728_v49 = vpop.permute.xlu1 %1727 }
 0x44c   : > { %2434 = vmatprep.subr.bf16.mxu1 %v2433_v42  ;;  %v2734_v9 = vpop.eup %2733 }
 0x44d   : > { %2436 = vmatpush1.bf16.msra.mxu1 %v2435_v45  ;;  %v2736_v4 = vpop.eup %2735  ;;  %v1733_v44 = vpop.permute.xlu0 %1732 }
 0x44e   : > { %v1738_v50 = vpop.permute.xlu1 %1737 }
 0x450   : > { %v2738_v10 = vpop.eup %2737 }
 0x451   : > { %v2740_v7 = vpop.eup %2739  ;;  %v2439_v14 = vpack.c.bf16 %v2738_v10, %v2734_v9  ;;  %v1743_v45 = vpop.permute.xlu0 %1742 }
 0x452   : > { %v2437_v15 = vpack.c.bf16 %v2740_v7, %v2736_v4  ;;  %v3857_v42 = vpop.permute.xlu1 %1747 }
 0x454   : > { %2438 = vmatprep.subr.bf16.mxu1 %v2437_v15 }
 0x455   : > { %2440 = vmatpush1.bf16.msra.mxu1 %v2439_v14  ;;  %v3859_v9 = vpop.permute.xlu0 %1752 }
 0x456   : > { %v3861_v4 = vpop.permute.xlu1 %1757 }
 0x458   : > { %1865 = vmatmul.mubr.f32.vlgmr.msra.gmra.mrb[32].mxu1 %v1415_v16 }
 0x459   : > { %1870 = vmatprep.mubr.f32.mxu1 %v2870_v46  ;;  %v3863_v10 = vpop.permute.xlu0 %1762 }
 0x45a   : > { %v2045_v16 = vpop.permute.xlu1 %2044 }
 0x45c   : > { %1871 = vmatmul.mubr.f32.gmra.mrb[34].mxu1 %v1416_v17 }
 0x45d   : > { %1876 = vmatprep.mubr.f32.mxu1 %v2870_v46 }
 0x460   : > { %1877 = vmatmul.mubr.f32.gmra.mrb[36].mxu1 %v1417_v19 }
 0x461   : > { %1882 = vmatprep.mubr.f32.mxu1 %v2870_v46 }
 0x464   : > { %1883 = vmatmul.mubr.f32.gmra.mrb[38].mxu1 %v1418_v34 }
 0x465   : > { %1888 = vmatprep.mubr.f32.mxu1 %v2870_v46 }
 0x468   : > { %1889 = vmatmul.mubr.f32.gmra.mrb[40].mxu1 %v1419_v37  ;;  %v2050_v37 = vpop.permute.xlu0 %2049 }
 0x469   : > { %1894 = vmatprep.mubr.f32.mxu1 %v2870_v46 }
 0x46c   : > { %1895 = vmatmul.mubr.f32.gmra.mrb[42].mxu1 %v1420_v40 }
 0x46d   : > { %1900 = vmatprep.mubr.f32.mxu1 %v2870_v46 }
 0x470   : > { %1901 = vmatmul.mubr.f32.gmra.mrb[44].mxu1 %v1421_v20 }
 0x471   : > { %1906 = vmatprep.mubr.f32.mxu1 %v2870_v46 }
 0x474   : > { %1907 = vmatmul.mubr.f32.gmra.mrb[46].mxu1 %v1422_v23 }
 0x475   : > { %1912 = vmatprep.mubr.f32.mxu1 %v2870_v46 }
 0x478   : > { %1913 = vmatmul.mubr.f32.gmra.mrb[48].mxu1 %v1423_v26 }
 0x479   : > { %1918 = vmatprep.mubr.f32.mxu1 %v2870_v46 }
 0x47c   : > { %1919 = vmatmul.mubr.f32.gmra.mrb[50].mxu1 %v1424_v24 }
 0x47d   : > { %1924 = vmatprep.mubr.f32.mxu1 %v2870_v46 }
 0x480   : > { %1925 = vmatmul.mubr.f32.gmra.mrb[52].mxu1 %v1425_v31 }
 0x481   : > { %1930 = vmatprep.mubr.f32.mxu1 %v2870_v46 }
 0x484   : > { %1931 = vmatmul.mubr.f32.gmra.mrb[54].mxu1 %v1426_v58  ;;  %v3869_v58 = vpop.permute.xlu1 %1767 }
 0x485   : > { %1936 = vmatprep.mubr.f32.mxu1 %v2870_v46 }
 0x488   : > { %1937 = vmatmul.mubr.f32.gmra.mrb[56].mxu1 %v1427_v36 }
 0x489   : > { %1942 = vmatprep.mubr.f32.mxu1 %v2870_v46 }
 0x48c   : > { %1943 = vmatmul.mubr.f32.gmra.mrb[58].mxu1 %v1428_v38 }
 0x48d   : > { %1948 = vmatprep.mubr.f32.mxu1 %v2870_v46 }
 0x490   : > { %1949 = vmatmul.mubr.f32.gmra.mrb[60].mxu1 %v1429_v39 }
 0x491   : > { %1954 = vmatprep.mubr.f32.mxu1 %v2870_v46 }
 0x494   : > { %1955 = vmatmul.mubr.f32.gmra.mrb[62].mxu1 %v1430_v41 }
 0x52b   : > { %v1866_v7 = vpop.f32.mrb[32].mxu1 }
 0x52c   : > { %v1867_v46 = vadd.f32 %v1866_v7, %v1723_v47  ;;  %v1868_v14 = vpop.f32.mrb[33].mxu1 }
 0x52d   : > { %v1869_v15 = vadd.f32 %v1868_v14, %v1723_v47 }
 0x52e   : > { %v1961_v17 = vadd.f32 %v3618_v5, %v1867_v46 }
 0x52f   : > { %v1962_v19 = vadd.f32 %v3611_v53, %v1869_v15  ;;  %v1872_v34 = vpop.f32.mrb[34].mxu1  ;;  %v2055_v53 = vpop.permute.xlu0 %2054 }
 0x530   : > { %v1873_v40 = vadd.f32 %v1872_v34, %v1728_v49  ;;  %v1874_v20 = vpop.f32.mrb[35].mxu1  ;;  %2741 = vtanh.f32 %v1961_v17 }
 0x531   : > { %v1875_v23 = vadd.f32 %v1874_v20, %v1728_v49  ;;  %2743 = vtanh.f32 %v1962_v19 }
 0x532   : > { %v1963_v26 = vadd.f32 %v3613_v18, %v1873_v40 }
 0x533   : > { %v1964_v24 = vadd.f32 %v3615_v2, %v1875_v23  ;;  %v1878_v31 = vpop.f32.mrb[36].mxu1  ;;  %v3873_v2 = vpop.permute.xlu1 %1772 }
 0x534   : > { %2745 = vtanh.f32 %v1963_v26  ;;  %v1879_v36 = vadd.f32 %v1878_v31, %v1733_v44  ;;  %v1880_v38 = vpop.f32.mrb[37].mxu1 }
 0x535   : > { %2747 = vtanh.f32 %v1964_v24  ;;  %v1881_v5 = vadd.f32 %v1880_v38, %v1733_v44  ;;  %v2060_v44 = vpop.permute.xlu0 %2059 }
 0x536   : > { %v1965_v39 = vadd.f32 %v3634_v33, %v1879_v36 }
 0x537   : > { %v1966_v41 = vadd.f32 %v3627_v8, %v1881_v5  ;;  %v1884_v47 = vpop.f32.mrb[38].mxu1  ;;  %v3879_v31 = vpop.permute.xlu1 %1777 }
 0x538   : > { %2749 = vtanh.f32 %v1965_v39  ;;  %v1885_v49 = vadd.f32 %v1884_v47, %v1738_v50  ;;  %v1886_v18 = vpop.f32.mrb[39].mxu1 }
 0x539   : > { %2751 = vtanh.f32 %v1966_v41  ;;  %v1887_v7 = vadd.f32 %v1886_v18, %v1738_v50 }
 0x53a   : > { %v1967_v46 = vadd.f32 %v3629_v11, %v1885_v49  ;;  %v2742_v17 = vpop.eup %2741 }
 0x53b   : > { %v1968_v14 = vadd.f32 %v3631_v35, %v1887_v7  ;;  %v1890_v15 = vpop.f32.mrb[40].mxu1  ;;  %v2744_v34 = vpop.eup %2743  ;;  %v2122_v50 = vmul.f32 %v2742_v17, %v2045_v16 }
 0x53c   : > { %2753 = vtanh.f32 %v1967_v46  ;;  %v1891_v19 = vadd.f32 %v1890_v15, %v1743_v45  ;;  %v1892_v33 = vpop.f32.mrb[41].mxu1  ;;  %v2123_v35 = vmul.f32 %v2744_v34, %v2045_v16 }
 0x53d   : > { %2755 = vtanh.f32 %v1968_v14  ;;  %v1893_v8 = vadd.f32 %v1892_v33, %v1743_v45 }
 0x53e   : > { %v2746_v40 = vpop.eup %2745  ;;  %v1969_v20 = vadd.f32 %v3650_v60, %v1891_v19  ;;  %v2065_v60 = vpop.permute.xlu0 %2064 }
 0x53f   : > { %v2748_v23 = vpop.eup %2747  ;;  %v2124_v26 = vmul.f32 %v2746_v40, %v2050_v37  ;;  %v1970_v24 = vadd.f32 %v3643_v52, %v1893_v8  ;;  %v1896_v11 = vpop.f32.mrb[42].mxu1 }
 0x540   : > { %v2125_v36 = vmul.f32 %v2748_v23, %v2050_v37  ;;  %2757 = vtanh.f32 %v1969_v20  ;;  %v1897_v38 = vadd.f32 %v1896_v11, %v3857_v42  ;;  %v1898_v5 = vpop.f32.mrb[43].mxu1  ;;  %v3887_v19 = vpop.permute.xlu1 %1782 }
 0x541   : > { %v2154_v39 = vadd.f32 %v2124_v26, %v2122_v50  ;;  %2759 = vtanh.f32 %v1970_v24  ;;  %v1899_v45 = vadd.f32 %v1898_v5, %v3857_v42 }
 0x542   : > { %v2750_v41 = vpop.eup %2749  ;;  %v2175_v47 = vadd.f32 %v2125_v36, %v2123_v35  ;;  %v1971_v49 = vadd.f32 %v3645_v62, %v1897_v38 }
 0x543   : > { %v2752_v18 = vpop.eup %2751  ;;  %v2126_v52 = vmul.f32 %v2750_v41, %v2055_v53  ;;  %v1972_v7 = vadd.f32 %v3647_v63, %v1899_v45  ;;  %v1902_v46 = vpop.f32.mrb[44].mxu1 }
 0x544   : > { %v2127_v16 = vmul.f32 %v2752_v18, %v2055_v53  ;;  %2761 = vtanh.f32 %v1971_v49  ;;  %v1903_v37 = vadd.f32 %v1902_v46, %v3859_v9  ;;  %v1904_v14 = vpop.f32.mrb[45].mxu1  ;;  %v2070_v53 = vpop.permute.xlu0 %2069 }
 0x545   : > { %v2155_v15 = vadd.f32 %v2154_v39, %v2126_v52  ;;  %2763 = vtanh.f32 %v1972_v7  ;;  %v1905_v17 = vadd.f32 %v1904_v14, %v3859_v9  ;;  %v3895_v5 = vpop.permute.xlu1 %1787 }
 0x546   : > { %v2754_v42 = vpop.eup %2753  ;;  %v2176_v33 = vadd.f32 %v2175_v47, %v2127_v16  ;;  %v1973_v62 = vadd.f32 %v3666_v27, %v1903_v37 }
 0x547   : > { %v2756_v34 = vpop.eup %2755  ;;  %v2128_v8 = vmul.f32 %v2754_v42, %v2060_v44  ;;  %v1974_v63 = vadd.f32 %v3659_v22, %v1905_v17  ;;  %v1908_v40 = vpop.f32.mrb[46].mxu1 }
 0x548   : > { %v2129_v20 = vmul.f32 %v2756_v34, %v2060_v44  ;;  %2765 = vtanh.f32 %v1973_v62  ;;  %v1909_v23 = vadd.f32 %v1908_v40, %v3861_v4  ;;  %v1910_v50 = vpop.f32.mrb[47].mxu1  ;;  %v2075_v49 = vpop.permute.xlu0 %2074 }
 0x549   : > { %v2156_v26 = vadd.f32 %v2155_v15, %v2128_v8  ;;  %2767 = vtanh.f32 %v1974_v63  ;;  %v1911_v9 = vadd.f32 %v1910_v50, %v3861_v4  ;;  %v3903_v17 = vpop.permute.xlu1 %1792 }
 0x54a   : > { %v2758_v24 = vpop.eup %2757  ;;  %v2177_v11 = vadd.f32 %v2176_v33, %v2129_v20  ;;  %v1975_v35 = vadd.f32 %v3661_v28, %v1909_v23 }
 0x54b   : > { %v2760_v27 = vpop.eup %2759  ;;  %v2130_v36 = vmul.f32 %v2758_v24, %v2065_v60  ;;  %v1976_v38 = vadd.f32 %v3663_v29, %v1911_v9  ;;  %v1914_v22 = vpop.f32.mrb[48].mxu1 }
 0x54c   : > { %v2131_v44 = vmul.f32 %v2760_v27, %v2065_v60  ;;  %2769 = vtanh.f32 %v1975_v35  ;;  %v1915_v39 = vadd.f32 %v1914_v22, %v3863_v10  ;;  %v1916_v45 = vpop.f32.mrb[49].mxu1  ;;  %v2080_v8 = vpop.permute.xlu0 %2079 }
 0x54d   : > { %v2157_v41 = vadd.f32 %v2156_v26, %v2130_v36  ;;  %2771 = vtanh.f32 %v1976_v38  ;;  %v1917_v4 = vadd.f32 %v1916_v45, %v3863_v10 }
 0x54e   : > { %v2762_v47 = vpop.eup %2761  ;;  %v2178_v18 = vadd.f32 %v2177_v11, %v2131_v44  ;;  %v1977_v28 = vadd.f32 %v3682_v57, %v1915_v39  ;;  %v3911_v11 = vpop.permute.xlu1 %1797 }
 0x54f   : > { %v2764_v52 = vpop.eup %2763  ;;  %v2132_v7 = vmul.f32 %v2762_v47, %v2070_v53  ;;  %v1978_v29 = vadd.f32 %v3675_v51, %v1917_v4  ;;  %v1920_v46 = vpop.f32.mrb[50].mxu1 }
 0x550   : > { %v2133_v16 = vmul.f32 %v2764_v52, %v2070_v53  ;;  %2773 = vtanh.f32 %v1977_v28  ;;  %v1921_v60 = vadd.f32 %v1920_v46, %v3869_v58  ;;  %v1922_v37 = vpop.f32.mrb[51].mxu1  ;;  %v2085_v44 = vpop.permute.xlu0 %2084 }
 0x551   : > { %v2158_v14 = vadd.f32 %v2157_v41, %v2132_v7  ;;  %2775 = vtanh.f32 %v1978_v29  ;;  %v1923_v15 = vadd.f32 %v1922_v37, %v3869_v58 }
 0x552   : > { %v2766_v10 = vpop.eup %2765  ;;  %v2179_v42 = vadd.f32 %v2178_v18, %v2133_v16  ;;  %v1979_v57 = vadd.f32 %v3677_v13, %v1921_v60  ;;  %v2090_v7 = vpop.permute.xlu1 %2089 }
 0x553   : > { %v2768_v33 = vpop.eup %2767  ;;  %v2134_v62 = vmul.f32 %v2766_v10, %v2075_v49  ;;  %v1980_v51 = vadd.f32 %v3679_v1, %v1923_v15  ;;  %v1926_v34 = vpop.f32.mrb[52].mxu1 }
 0x554   : > { %v2135_v63 = vmul.f32 %v2768_v33, %v2075_v49  ;;  %2777 = vtanh.f32 %v1979_v57  ;;  %v1927_v40 = vadd.f32 %v1926_v34, %v3873_v2  ;;  %v1928_v53 = vpop.f32.mrb[53].mxu1  ;;  %v2095_v57 = vpop.permute.xlu0 %2094 }
 0x555   : > { %v2159_v20 = vadd.f32 %v2158_v14, %v2134_v62  ;;  %2779 = vtanh.f32 %v1980_v51  ;;  %v1929_v58 = vadd.f32 %v1928_v53, %v3873_v2 }
 0x556   : > { %v2770_v23 = vpop.eup %2769  ;;  %v2180_v50 = vadd.f32 %v2179_v42, %v2135_v63  ;;  %v1981_v26 = vadd.f32 %v3698_v25, %v1927_v40 }
 0x557   : > { %v2772_v13 = vpop.eup %2771  ;;  %v2136_v9 = vmul.f32 %v2770_v23, %v2080_v8  ;;  %v1982_v24 = vadd.f32 %v3691_v21, %v1929_v58  ;;  %v1932_v1 = vpop.f32.mrb[54].mxu1 }
 0x558   : > { %v2137_v35 = vmul.f32 %v2772_v13, %v2080_v8  ;;  %2781 = vtanh.f32 %v1981_v26  ;;  %v1933_v27 = vadd.f32 %v1932_v1, %v3879_v31  ;;  %v1934_v36 = vpop.f32.mrb[55].mxu1  ;;  %v2100_v58 = vpop.permute.xlu1 %2099 }
 0x559   : > { %v2160_v38 = vadd.f32 %v2159_v20, %v2136_v9  ;;  %2783 = vtanh.f32 %v1982_v24  ;;  %v1935_v2 = vadd.f32 %v1934_v36, %v3879_v31  ;;  %v2105_v36 = vpop.permute.xlu0 %2104 }
 0x55a   : > { %v2774_v22 = vpop.eup %2773  ;;  %v2181_v39 = vadd.f32 %v2180_v50, %v2137_v35  ;;  %v1983_v25 = vadd.f32 %v3693_v32, %v1933_v27 }
 0x55b   : > { %v2776_v45 = vpop.eup %2775  ;;  %v2138_v41 = vmul.f32 %v2774_v22, %v2085_v44  ;;  %v1984_v21 = vadd.f32 %v3695_v30, %v1935_v2  ;;  %v1938_v4 = vpop.f32.mrb[56].mxu1 }
 0x55c   : > { %v2139_v47 = vmul.f32 %v2776_v45, %v2085_v44  ;;  %2785 = vtanh.f32 %v1983_v25  ;;  %v1939_v49 = vadd.f32 %v1938_v4, %v3887_v19  ;;  %v1940_v18 = vpop.f32.mrb[57].mxu1  ;;  %v2110_v45 = vpop.permute.xlu1 %2109 }
 0x55d   : > { %v2161_v28 = vadd.f32 %v2160_v38, %v2138_v41  ;;  %2787 = vtanh.f32 %v1984_v21  ;;  %v1941_v52 = vadd.f32 %v1940_v18, %v3887_v19  ;;  %v2115_v18 = vpop.permute.xlu0 %2114 }
 0x55e   : > { %v2778_v31 = vpop.eup %2777  ;;  %v2182_v29 = vadd.f32 %v2181_v39, %v2139_v47  ;;  %v1985_v46 = vadd.f32 %v3713_v48, %v1939_v49 }
 0x55f   : > { %v2780_v32 = vpop.eup %2779  ;;  %v2140_v16 = vmul.f32 %v2778_v31, %v2090_v7  ;;  %v1986_v60 = vadd.f32 %v3707_v12, %v1941_v52  ;;  %v1944_v30 = vpop.f32.mrb[58].mxu1 }
 0x560   : > { %v2141_v37 = vmul.f32 %v2780_v32, %v2090_v7  ;;  %2789 = vtanh.f32 %v1985_v46  ;;  %v1945_v14 = vadd.f32 %v1944_v30, %v3895_v5  ;;  %v1946_v15 = vpop.f32.mrb[59].mxu1 }
 0x561   : > { %v2162_v10 = vadd.f32 %v2161_v28, %v2140_v16  ;;  %2791 = vtanh.f32 %v1986_v60  ;;  %v1947_v42 = vadd.f32 %v1946_v15, %v3895_v5 }
 0x562   : > { %v2782_v19 = vpop.eup %2781  ;;  %v2183_v33 = vadd.f32 %v2182_v29, %v2141_v37  ;;  %v1987_v62 = vadd.f32 %v3709_v6, %v1945_v14 }
 0x563   : > { %v2784_v48 = vpop.eup %2783  ;;  %v2142_v51 = vmul.f32 %v2782_v19, %v2095_v57  ;;  %v1988_v34 = vadd.f32 %v3711_v54, %v1947_v42  ;;  %v1950_v12 = vpop.f32.mrb[60].mxu1 }
 0x564   : > { %v2143_v8 = vmul.f32 %v2784_v48, %v2095_v57  ;;  %2793 = vtanh.f32 %v1987_v62  ;;  %v1951_v63 = vadd.f32 %v1950_v12, %v3903_v17  ;;  %v1952_v40 = vpop.f32.mrb[61].mxu1 }
 0x565   : > { %v2163_v53 = vadd.f32 %v2162_v10, %v2142_v51  ;;  %2795 = vtanh.f32 %v1988_v34  ;;  %v1953_v20 = vadd.f32 %v1952_v40, %v3903_v17  ;;  %v2199_v51 = vpop.permute.xlu0 %2198 }
 0x566   : > { %v2786_v5 = vpop.eup %2785  ;;  %v2184_v23 = vadd.f32 %v2183_v33, %v2143_v8  ;;  %v1989_v50 = vadd.f32 %v3725_v56, %v1951_v63  ;;  %v2871_v33 = vmov 1966171168   ;;  %v2204_v40 = vrot.slane %v2199_v51, %v557_v3 }
 0x567   : > { %v2788_v6 = vpop.eup %2787  ;;  %v2144_v26 = vmul.f32 %v2786_v5, %v2100_v58  ;;  %v1990_v13 = vadd.f32 %v3719_v43, %v1953_v20  ;;  %v1956_v54 = vpop.f32.mrb[62].mxu1  ;;  %v2211_v62 = vunpack.c.l.s4 %v2871_v33 }
 0x568   : > { %v2145_v9 = vmul.f32 %v2788_v6, %v2100_v58  ;;  %2797 = vtanh.f32 %v1989_v50  ;;  %v1957_v24 = vadd.f32 %v1956_v54, %v3911_v11  ;;  %v1958_v1 = vpop.f32.mrb[63].mxu1 }
 0x569   : > { %v2164_v35 = vadd.f32 %v2163_v53, %v2144_v26  ;;  %2799 = vtanh.f32 %v1990_v13  ;;  %v1959_v27 = vadd.f32 %v1958_v1, %v3911_v11  ;;  %v2212_v63 = vunpack.c.0.s8 %v2211_v62 }
 0x56a   : > { %v2790_v17 = vpop.eup %2789  ;;  %v2185_v38 = vadd.f32 %v2184_v23, %v2145_v9  ;;  %v1991_v2 = vadd.f32 %v3721_v55, %v1957_v24 }
 0x56b   : > { %v2792_v56 = vpop.eup %2791  ;;  %v2146_v22 = vmul.f32 %v2790_v17, %v2105_v36  ;;  %v1992_v44 = vadd.f32 %v3723_v59, %v1959_v27  ;;  %v2120_v59 = vpop.permute.xlu1 %2119  ;;  %v2215_v23 = vsub.s32 %v2212_v63, %v3178_v0 }
 0x56c   : > { %v2147_v43 = vmul.f32 %v2792_v56, %v2105_v36  ;;  %2801 = vtanh.f32 %v1991_v2 }
 0x56d   : > { %v2165_v39 = vadd.f32 %v2164_v35, %v2146_v22  ;;  %2803 = vtanh.f32 %v1992_v44 }
 0x56e   : > { %v2794_v25 = vpop.eup %2793  ;;  %v2186_v41 = vadd.f32 %v2185_v38, %v2147_v43 }
 0x56f   : > { %v2796_v21 = vpop.eup %2795  ;;  %v2148_v4 = vmul.f32 %v2794_v25, %v2110_v45 }
 0x570   : > { %v2149_v47 = vmul.f32 %v2796_v21, %v2110_v45 }
 0x571   : > { %v2166_v11 = vadd.f32 %v2165_v39, %v2148_v4 }
 0x572   : > { %v2798_v49 = vpop.eup %2797  ;;  %v2187_v28 = vadd.f32 %v2186_v41, %v2149_v47 }
 0x573   : > { %v2800_v52 = vpop.eup %2799  ;;  %v2150_v55 = vmul.f32 %v2798_v49, %v2115_v18 }
 0x574   : > { %v2151_v31 = vmul.f32 %v2800_v52, %v2115_v18 }
 0x575   : > { %v2167_v7 = vadd.f32 %v2166_v11, %v2150_v55 }
 0x576   : > { %v2802_v29 = vpop.eup %2801  ;;  %v2188_v46 = vadd.f32 %v2187_v28, %v2151_v31 }
 0x577   : > { %v2804_v32 = vpop.eup %2803  ;;  %v2152_v16 = vmul.f32 %v2802_v29, %v2120_v59 }
 0x578   : > { %v2153_v60 = vmul.f32 %v2804_v32, %v2120_v59 }
 0x579   : > { %v2168_v30 = vadd.f32 %v2167_v7, %v2152_v16 }
 0x57a   : > { %v2189_v37 = vadd.f32 %v2188_v46, %v2153_v60 }
 0x57b   : > { %v2169_v14 = vrot.slane %v2168_v30, 4 }
 0x57c   : > { %v2190_v15 = vrot.slane %v2189_v37, 4 }
 0x57d   : > { %v2170_v10 = vadd.f32 %v2169_v14, %v2168_v30 }
 0x57e   : > { %v2191_v42 = vadd.f32 %v2190_v15, %v2189_v37 }
 0x57f   : > { %v2171_v19 = vrot.slane %v2170_v10, 2 }
 0x580   : > { %v2192_v57 = vrot.slane %v2191_v42, 2 }
 0x581   : > { %v2172_v48 = vadd.f32 %v2171_v19, %v2170_v10 }
 0x582   : > { %v2193_v34 = vadd.f32 %v2192_v57, %v2191_v42 }
 0x583   : > { %v2173_v12 = vrot.slane %v2172_v48, 1 }
 0x584   : > { %v2194_v8 = vrot.slane %v2193_v34, 1 }
 0x585   : > { %v2174_v53 = vadd.f32 %v2173_v12, %v2172_v48 }
 0x586   : > { %v2195_v20 = vadd.f32 %v2194_v8, %v2193_v34 }
 0x587   : > { %v2205_v5 = vadd.f32 %v2204_v40, %v2174_v53 }
 0x588   : > { %v2206_v58 = vadd.f32 %v2204_v40, %v2195_v20 }
 0x58a   : > { %v2209_v50 = vcombine.low %v2205_v5, %v2206_v58 }
 0x58c   : > { %v2216_v6 = vrot.slane %v2209_v50, %v2215_v23 }
 0x58e   : > { %v2223_v26 = vrot.slane %v2216_v6, %v2215_v23 }
 0x590   : > { %2229 = vst.msk [vmem:[%s434_s22] sm:$0x3] %vm2227_vm0, %v2223_v26 }
 0x591   : > { %2818 = shalt.err (!%p2815_p3)
}
 0x592   : > { %s2819_s16 = scalar_lea.hbm %s3942_s25, 32  ;;  %s2823_s22 = scalar_lea.hbm %s3997_s13, 64 }
 0x593   : > { %p2820_p4 = scmp.ne.s32.totalorder %s3942_s25, %s2819_s16  ;;  %p2824_p9 = scmp.lt.u32.totalorder %s3942_s25, %s3997_s13 }
 0x594   : > { %p2825_p10 = scmp.lt.u32.totalorder %s2823_s22, %s2819_s16  ;;  %p2827_p12 = scmp.lt.u32.totalorder %s2819_s16, %s3942_s25 }
 0x595   : > { %p2821_p7 = pnand %p2820_p4, %p2984_p5 }
 0x596   : > { %p2826_p11 = por %p2825_p10, %p2824_p9 }
 0x597   : > { %p2822_p8 = pneg %p2821_p7 }
 0x598   : > { %p2828_p13 = por %p2827_p12, %p2826_p11 }
 0x59a   : > { %p2829_p0 = pnand %p2828_p13, %p2822_p8 }
 0x59c   : > { %2832 = shalt.err (!%p2829_p0)
}
 0x59d   : > { %2441 = dma.vmem_to_hbm [thread:$0]  (%p2984_p5), %s3944_s18, 32, %s3942_s25, %s2231_s1  }
 0x59e PF: > { %p2447_p1 = scmp.ge.s32.totalorder %s2867_s30, 2  ;;  %s2257_s2 = sand.u32 1, %s2855_s27  }
 0x59f   : > { %s2258_s12 = scalar_lea.sflag [#allocation4], %s2257_s2 }
 0x5a0   : > { %p2444_p2 = pnand %p2447_p1, %p2988_p6 }
 0x5a2   : > { %2850 = dma.done.wait (!%p2444_p2), %s2258_s12, 32  }
 0x5a3   : > { %2852 = vsyncadd (!%p2444_p2), %s2258_s12, 4294967264  ;;  %s4005_s26 = sld [smem:[#allocation6_spill]]  ;;  %p25_p3 = scmp.ge.s32.totalorder %s2971_s15, 4  }
 0x5a4   : > { %s4006_s27 = smov %s2859_s28  ;;  %s4007_s28 = smov %s2863_s29 }
 0x5a5   : > { %s4009_s30 = smov %s2971_s15  ;;  %27 = sbr.rel (!%p25_p3) target bundleno = 6 (0x6), region = 107 }
 0x5a9   : > { %s4008_s29 = smov %s4005_s26 }
 0x5ac   :  { %2263 = vsyncpa [#allocation4], 1 }
 0x5ad   :  { %2265 = vsyncpa [#allocation4 + $0x1], 1 }

</bundles_post_ra>
